<compile_context>
chip_gen: v6e
topology: v6e:2x2x1
jax: 0.10.0
libtpu: 0.0.40
codegen_flags: <defaults>
</compile_context>

<pallas_src>
import functools

import jax
import jax.numpy as jnp
from jax.experimental import pallas as pl
from jax.experimental.pallas import tpu as pltpu


def _leaky(x):
    # torch.nn.LeakyReLU(negative_slope=0.1)
    return jnp.where(x > 0, x, 0.1 * x)


# -----------------------------------------------------------------------------
# Kernel (one grid step == one (x_robot, x_task) problem instance)
# -----------------------------------------------------------------------------
def _policy_kernel(scal_ref, x_ref, slab_ref, out_ref, *,
                   num_gnn_layers: int, lane: int, feat_pad: int,
                   n_robots: int, n_tasks: int):
    """scal_ref: SMEM (2,) = [1/temperature, s2_bias]
       x_ref:    (N+M, 2*feat_pad) block-diagonal features
                 (robot feats in rows [0:N], cols [0:feat_pad];
                  task  feats in rows [N:N+M], cols [feat_pad:2*feat_pad])
       slab_ref: (rows, lane) packed, lane-padded weight slab + 16 bias rows
       out_ref:  (N, lane)    lane-padded task probabilities (cols [0:M] valid)
    """
    f32 = jnp.float32
    N, M = n_robots, n_tasks

    def mm(a, b):
        return jnp.dot(a, b, preferred_element_type=f32)

    # ---- static row offsets into the packed slab ----------------------------
    off_proj = 0
    off_gnn = 2 * feat_pad
    off_skip = off_gnn + 2 * lane * num_gnn_layers
    off_s1r = off_skip + lane * (num_gnn_layers - 1)
    off_s1t = off_s1r + lane
    off_bias = off_s1t + lane          # 16 bias rows appended at the bottom

    def brow(k):                        # one lane-padded bias row (1, lane)
        r = off_bias + k
        return slab_ref[r:r + 1, :]

    b_gnn0 = 2
    b_skip0 = 2 + 2 * num_gnn_layers
    b_s1 = b_skip0 + (num_gnn_layers - 1)
    b_s2w = b_s1 + 1                   # selector second-layer weight as a row

    # ---- fused robot/task input projections (one matmul, shared weight load)
    xproj = mm(x_ref[...], slab_ref[off_proj:off_proj + 2 * feat_pad, :])
    robot_hidden = xproj[0:N, :] + brow(0)           # (N, lane)
    task_hidden = xproj[N:N + M, :] + brow(1)        # (M, lane)

    # ---- GNN layers (aggregated robot messages are identically zero) --------
    layer_outputs = [robot_hidden]
    for i in range(num_gnn_layers):
        o = off_gnn + 2 * lane * i
        # f_theta_v(cat([0, x_robot])) == leaky(x_robot @ W1_robot + b1) @ W2 + b2
        hid = _leaky(mm(robot_hidden, slab_ref[o:o + lane, :])
                     + brow(b_gnn0 + 2 * i))
        new_rh = (mm(hid, slab_ref[o + lane:o + 2 * lane, :])
                  + brow(b_gnn0 + 2 * i + 1))
        if i > 0:  # skip_connections[i-1](layer_outputs[max(0, i-2)])
            so = off_skip + lane * (i - 1)
            skip_in = layer_outputs[max(0, i - 2)]
            new_rh = new_rh + mm(skip_in, slab_ref[so:so + lane, :]) + brow(b_skip0 + i - 1)
        robot_hidden = robot_hidden + new_rh
        layer_outputs.append(robot_hidden)

    # ---- TaskSelectionMLP ----------------------------------------------------
    # cat([robot, task]) @ W1 == robot @ W1_r + task @ W1_t; s1 bias folded into
    # pre_r (adds on one (N,lane) vreg instead of the (N,M,lane) broadcast).
    pre_r = mm(robot_hidden, slab_ref[off_s1r:off_s1r + lane, :]) + brow(b_s1)
    pre_t = mm(task_hidden, slab_ref[off_s1t:off_s1t + lane, :])
    hid3 = _leaky(pre_r[:, None, :] + pre_t[None, :, :])        # (N, M, lane)
    # second linear (MH -> 1) as multiply + lane reduce; s2 bias from SMEM
    scores = jnp.sum(hid3 * brow(b_s2w), axis=-1) + scal_ref[1]  # (N, M)

    scores = jnp.clip(scores, -10.0, 10.0)
    scores = scores - jnp.max(scores, axis=1, keepdims=True)     # row max -> 0
    e = jnp.exp(scores * scal_ref[0])                            # * (1/temp)
    probs = e / jnp.sum(e, axis=1, keepdims=True)                # exact softmax
    probs = jnp.clip(probs, 1e-6, 1.0 - 1e-6)

    # lane-dense store: pad the M real columns to a full 128-lane block
    if M < lane:
        probs = jnp.concatenate([probs, jnp.zeros((N, lane - M), f32)], axis=1)
    out_ref[...] = probs


# -----------------------------------------------------------------------------
# Parameter init (torch-default-style) + packing into one lane-padded slab
# -----------------------------------------------------------------------------
def _torch_linear(k, fan_in, fan_out):
    kw, kb = jax.random.split(k)
    bound = fan_in ** -0.5
    w = jax.random.uniform(kw, (fan_out, fan_in), jnp.float32, -bound, bound)
    b = jax.random.uniform(kb, (fan_out,), jnp.float32, -bound, bound)
    return w, b


def init_raw_params(key, robot_dim, task_dim, gnn_hidden, mlp_hidden,
                    num_gnn_layers=3):
    """Raw (unpadded) params mirroring the torch module layout (f_theta_e omitted:
    it provably never affects the forward output)."""
    H, MH = gnn_hidden, mlp_hidden
    n_keys = 2 + 2 * num_gnn_layers + (num_gnn_layers - 1) + 2
    keys = jax.random.split(key, n_keys)
    ki = iter(range(n_keys))

    rp_w, rp_b = _torch_linear(keys[next(ki)], robot_dim, H)
    tp_w, tp_b = _torch_linear(keys[next(ki)], task_dim, H)

    gnn = []
    for _ in range(num_gnn_layers):
        v1_w, v1_b = _torch_linear(keys[next(ki)], 2 * H, H)
        v2_w, v2_b = _torch_linear(keys[next(ki)], H, H)
        gnn.append((v1_w, v1_b, v2_w, v2_b))

    skips = []
    for _ in range(num_gnn_layers - 1):
        sk_w, sk_b = _torch_linear(keys[next(ki)], H, H)
        skips.append((sk_w, sk_b))

    s1_w, s1_b = _torch_linear(keys[next(ki)], 2 * H, MH)
    s2_w, s2_b = _torch_linear(keys[next(ki)], MH, 1)

    return dict(rp_w=rp_w, rp_b=rp_b, tp_w=tp_w, tp_b=tp_b, gnn=gnn, skips=skips,
                s1_w=s1_w, s1_b=s1_b, s2_w=s2_w, s2_b=s2_b,
                H=H, MH=MH, num_gnn_layers=num_gnn_layers)


def pack_params(raw, lane=128, feat_pad=8):
    """Pack all weights + 16 bias rows into ONE (rows, lane) slab, zero-padded.
    Layout must match _policy_kernel."""
    H, MH, L = raw["H"], raw["MH"], raw["num_gnn_layers"]
    assert H <= lane and MH <= lane
    f32 = jnp.float32

    def pad_blk(mat, rows, cols=lane):
        r, c = mat.shape
        assert r <= rows and c <= cols
        return jnp.zeros((rows, cols), f32).at[:r, :c].set(mat.astype(f32))

    def pad_row(v, cols=lane):
        return jnp.zeros((cols,), f32).at[:v.shape[0]].set(v.astype(f32))

    # fused input projection block: rows [0:feat_pad] robot, [feat_pad:2fp] task
    proj = jnp.zeros((2 * feat_pad, lane), f32)
    proj = proj.at[:raw["rp_w"].shape[1], :H].set(raw["rp_w"].T)
    proj = proj.at[feat_pad:feat_pad + raw["tp_w"].shape[1], :H].set(raw["tp_w"].T)

    w_blocks = [proj]
    b_rows = [pad_row(raw["rp_b"]), pad_row(raw["tp_b"])]

    for (v1_w, v1_b, v2_w, v2_b) in raw["gnn"]:
        # only the x_robot half of W1 matters (message half multiplies zeros)
        w_blocks.append(pad_blk(v1_w[:, H:].T, lane))
        w_blocks.append(pad_blk(v2_w.T, lane))
        b_rows += [pad_row(v1_b), pad_row(v2_b)]

    for (sk_w, sk_b) in raw["skips"]:
        w_blocks.append(pad_blk(sk_w.T, lane))
        b_rows.append(pad_row(sk_b))

    w_blocks.append(pad_blk(raw["s1_w"][:, :H].T, lane))   # robot half of selector W1
    w_blocks.append(pad_blk(raw["s1_w"][:, H:].T, lane))   # task half of selector W1
    b_rows.append(pad_row(raw["s1_b"]))
    b_rows.append(pad_row(raw["s2_w"][0]))                 # selector W2 as a row vector

    while len(b_rows) < 16:
        b_rows.append(jnp.zeros((lane,), f32))

    slab = jnp.concatenate(w_blocks + [jnp.stack(b_rows, axis=0)], axis=0)
    # rows = 2*feat_pad + (3L+1)*lane + 16
    return slab, raw["s2_b"].astype(f32)                    # s2_b shape (1,)


# -----------------------------------------------------------------------------
# Wrappers
# -----------------------------------------------------------------------------
def robot_task_policy_forward_batched(packed, x_robot, x_task, edge_index, edge_attr,
                                      episode, temperature=1.0, num_episodes=1000,
                                      num_gnn_layers=3, lane=128, feat_pad=8):
    """x_robot: (B, N, robot_dim), x_task: (B, M, task_dim) -> (B, N, M) probs."""
    # edge_index / edge_attr cannot affect the output of the reference module
    # (messages aggregate onto task rows only; the robot slice consumed is zero).
    del edge_index, edge_attr
    slab, s2_b = packed
    B, n, dr = x_robot.shape
    _, m, dt = x_task.shape
    assert dr <= feat_pad and dt <= feat_pad and m <= lane

    if episode is not None:
        current_temp = max(temperature * (1.0 - episode / num_episodes), 0.1)
    else:
        current_temp = temperature
    scalars = jnp.concatenate([jnp.asarray([1.0 / current_temp], jnp.float32),
                               jnp.reshape(s2_b, (1,))])

    # single cast + block-diagonal packing of the tiny feature matrices
    xcomb = jnp.zeros((B, n + m, 2 * feat_pad), jnp.float32)
    xcomb = xcomb.at[:, :n, :dr].set(x_robot.astype(jnp.float32))
    xcomb = xcomb.at[:, n:, feat_pad:feat_pad + dt].set(x_task.astype(jnp.float32))

    kernel = functools.partial(_policy_kernel, num_gnn_layers=num_gnn_layers,
                               lane=lane, feat_pad=feat_pad, n_robots=n, n_tasks=m)

    out = pl.pallas_call(
        kernel,
        out_shape=jax.ShapeDtypeStruct((B, n, lane), jnp.float32),
        grid=(B,),
        in_specs=[
            # temperature / s2 bias scalars, whole array in SMEM
            pl.BlockSpec(memory_space=pltpu.MemorySpace.SMEM),
            # per-instance features: one (N+M, 2*feat_pad) block per grid step
            pl.BlockSpec((None, n + m, 2 * feat_pad), lambda b: (b, 0, 0)),
            # parameter slab: constant block index -> DMA'd once, stays resident
            pl.BlockSpec(slab.shape, lambda b: (0, 0)),
        ],
        # lane-dense (N, 128) block per grid step (full vst, no masked stores)
        out_specs=pl.BlockSpec((None, n, lane), lambda b: (b, 0, 0)),
        compiler_params=pltpu.CompilerParams(
            dimension_semantics=("parallel",)),   # shard batch over v7x's 2 TCs
    )(scalars, xcomb, slab)

    return out[:, :, :m]


def robot_task_policy_forward(packed, x_robot, x_task, edge_index, edge_attr, episode,
                              temperature=1.0, num_episodes=1000,
                              num_gnn_layers=3, lane=128, feat_pad=8):
    """Single-graph convenience wrapper (B=1)."""
    out = robot_task_policy_forward_batched(
        packed, x_robot[None], x_task[None], edge_index, edge_attr, episode,
        temperature=temperature, num_episodes=num_episodes,
        num_gnn_layers=num_gnn_layers, lane=lane, feat_pad=feat_pad)
    return out[0]


# -----------------------------------------------------------------------------
# Pure-JAX reference (mirrors the torch module) for a correctness check
# -----------------------------------------------------------------------------
def reference_forward(raw, x_robot, x_task, episode, temperature=1.0, num_episodes=1000):
    hi = jax.lax.Precision.HIGHEST

    def lin(x, w, b):
        return jnp.dot(x, w.T, precision=hi) + b

    rh = lin(x_robot, raw["rp_w"], raw["rp_b"])
    th = lin(x_task, raw["tp_w"], raw["tp_b"])
    layer_outputs = [rh]
    for i, (v1_w, v1_b, v2_w, v2_b) in enumerate(raw["gnn"]):
        upd_in = jnp.concatenate([jnp.zeros_like(rh), rh], axis=1)  # robot messages == 0
        new = lin(_leaky(lin(upd_in, v1_w, v1_b)), v2_w, v2_b)
        if i > 0:
            sk_w, sk_b = raw["skips"][i - 1]
            new = new + lin(layer_outputs[max(0, i - 2)], sk_w, sk_b)
        rh = rh + new
        layer_outputs.append(rh)

    N, M = rh.shape[0], th.shape[0]
    comb = jnp.concatenate([jnp.broadcast_to(rh[:, None, :], (N, M, rh.shape[1])),
                            jnp.broadcast_to(th[None, :, :], (N, M, th.shape[1]))], axis=2)
    scores = lin(_leaky(lin(comb.reshape(N * M, -1), raw["s1_w"], raw["s1_b"])),
                 raw["s2_w"], raw["s2_b"]).reshape(N, M)
    scores = jnp.clip(scores, -10.0, 10.0)
    scores = scores - jnp.max(scores, axis=1, keepdims=True)
    if episode is not None:
        temp = max(temperature * (1.0 - episode / num_episodes), 0.1)
    else:
        temp = temperature
    probs = jax.nn.softmax(scores / temp, axis=1)
    return jnp.clip(probs, 1e-6, 1.0 - 1e-6)


# -----------------------------------------------------------------------------
if __name__ == "__main__":
    robot_dim, task_dim, edge_dim = 6, 5, 4
    gnn_hidden, mlp_hidden = 32, 64
    n_robots, n_tasks, batch = 8, 8, 4

    key = jax.random.PRNGKey(0)
    kp, kr, kt, ke = jax.random.split(key, 4)

    raw = init_raw_params(kp, robot_dim, task_dim, gnn_hidden, mlp_hidden)
    packed = pack_params(raw, lane=128, feat_pad=8)

    x_robot = jax.random.normal(kr, (batch, n_robots, robot_dim), jnp.float32)
    x_task = jax.random.normal(kt, (batch, n_tasks, task_dim), jnp.float32)

    # fully connected bipartite robot->task graph (provably no influence on output)
    ri = jnp.repeat(jnp.arange(n_robots), n_tasks)
    ti = jnp.tile(jnp.arange(n_tasks), n_robots)
    edge_index = jnp.stack([ri, ti], axis=0)
    edge_attr = jax.random.normal(ke, (n_robots * n_tasks, edge_dim), jnp.float32)

    probs = robot_task_policy_forward_batched(packed, x_robot, x_task,
                                              edge_index, edge_attr, episode=100)
    probs = jax.block_until_ready(probs)

    assert probs.shape == (batch, n_robots, n_tasks)
    assert bool(jnp.all(jnp.isfinite(probs)))
    for b in range(batch):
        ref = reference_forward(raw, x_robot[b], x_task[b], episode=100)
        assert bool(jnp.max(jnp.abs(probs[b] - ref)) < 5e-3), f"mismatch in batch {b}"

    # single-graph API (B=1) still works
    p1 = robot_task_policy_forward(packed, x_robot[0], x_task[0],
                                   edge_index, edge_attr, episode=100)
    p1 = jax.block_until_ready(p1)
    assert p1.shape == (n_robots, n_tasks)
    assert bool(jnp.max(jnp.abs(p1 - probs[0])) < 1e-6)

    print("KERNEL_OK")
</pallas_src>

<mosaic_0001>
module attributes {stable_mosaic.version = 11 : i64} {
  func.func @_policy_kernel(%arg0: i32, %arg1: memref<2xf32, #tpu.memory_space<smem>>, %arg2: memref<1x16x16xf32, #tpu.memory_space<vmem>>, %arg3: memref<1312x128xf32, #tpu.memory_space<vmem>>, %arg4: memref<1x8x128xf32, #tpu.memory_space<vmem>>) attributes {dimension_semantics = [#tpu.dimension_semantics<parallel>], iteration_bounds = array<i64: 4>, scalar_prefetch = 0 : i64, scratch_operands = 0 : i64, tpu.core_type = #tpu.core_type<tc>, window_params = [{transform_indices = @transform_0, window_bounds = array<i64: 2>}, {transform_indices = @transform_1, window_bounds = array<i64: 1, 16, 16>}, {pipeline_mode = #tpu.pipeline_mode<synchronous>, transform_indices = @transform_2, window_bounds = array<i64: 1312, 128>}, {transform_indices = @transform_3, window_bounds = array<i64: 1, 8, 128>}]} {
    %c0 = arith.constant 0 : index
    %c0_0 = arith.constant 0 : index
    %c0_1 = arith.constant 0 : index
    %0 = vector.load %arg2[%c0, %c0_0, %c0_1] : memref<1x16x16xf32, #tpu.memory_space<vmem>>, vector<1x16x16xf32>
    %1 = vector.shape_cast %0 : vector<1x16x16xf32> to vector<16x16xf32>
    %c0_2 = arith.constant 0 : index
    %c0_3 = arith.constant 0 : index
    %2 = vector.load %arg3[%c0_2, %c0_3] : memref<1312x128xf32, #tpu.memory_space<vmem>>, vector<16x128xf32>
    %cst = arith.constant dense<0.000000e+00> : vector<16x128xf32>
    %3 = tpu.matmul %1, %2, %cst {dimension_numbers = #tpu.dot_dimension_numbers<[1], [0], [0], [1], [0, 0, 1, 1], [], []>} : vector<16x16xf32>, vector<16x128xf32>, vector<16x128xf32> -> vector<16x128xf32>
    %4 = vector.extract_strided_slice %3 {offsets = [0, 0], sizes = [8, 128], strides = [1, 1]} : vector<16x128xf32> to vector<8x128xf32>
    %c1296 = arith.constant 1296 : index
    %c0_4 = arith.constant 0 : index
    %5 = vector.load %arg3[%c1296, %c0_4] : memref<1312x128xf32, #tpu.memory_space<vmem>>, vector<1x128xf32>
    %6 = vector.broadcast %5 : vector<1x128xf32> to vector<8x128xf32>
    %7 = arith.addf %4, %6 : vector<8x128xf32>
    %8 = vector.extract_strided_slice %3 {offsets = [8, 0], sizes = [8, 128], strides = [1, 1]} : vector<16x128xf32> to vector<8x128xf32>
    %c1297 = arith.constant 1297 : index
    %c0_5 = arith.constant 0 : index
    %9 = vector.load %arg3[%c1297, %c0_5] : memref<1312x128xf32, #tpu.memory_space<vmem>>, vector<1x128xf32>
    %10 = vector.broadcast %9 : vector<1x128xf32> to vector<8x128xf32>
    %11 = arith.addf %8, %10 : vector<8x128xf32>
    %c16 = arith.constant 16 : index
    %c0_6 = arith.constant 0 : index
    %12 = vector.load %arg3[%c16, %c0_6] : memref<1312x128xf32, #tpu.memory_space<vmem>>, vector<128x128xf32>
    %cst_7 = arith.constant dense<0.000000e+00> : vector<8x128xf32>
    %13 = tpu.matmul %7, %12, %cst_7 {dimension_numbers = #tpu.dot_dimension_numbers<[1], [0], [0], [1], [0, 0, 1, 1], [], []>} : vector<8x128xf32>, vector<128x128xf32>, vector<8x128xf32> -> vector<8x128xf32>
    %c1298 = arith.constant 1298 : index
    %c0_8 = arith.constant 0 : index
    %14 = vector.load %arg3[%c1298, %c0_8] : memref<1312x128xf32, #tpu.memory_space<vmem>>, vector<1x128xf32>
    %15 = vector.broadcast %14 : vector<1x128xf32> to vector<8x128xf32>
    %16 = arith.addf %13, %15 : vector<8x128xf32>
    %cst_9 = arith.constant 0.000000e+00 : f32
    %17 = vector.broadcast %cst_9 : f32 to vector<8x128xf32>
    %18 = arith.cmpf ogt, %16, %17 : vector<8x128xf32>
    %cst_10 = arith.constant 1.000000e-01 : f32
    %19 = vector.broadcast %cst_10 : f32 to vector<8x128xf32>
    %20 = arith.mulf %19, %16 : vector<8x128xf32>
    %21 = arith.select %18, %16, %20 : vector<8x128xi1>, vector<8x128xf32>
    %c144 = arith.constant 144 : index
    %c0_11 = arith.constant 0 : index
    %22 = vector.load %arg3[%c144, %c0_11] : memref<1312x128xf32, #tpu.memory_space<vmem>>, vector<128x128xf32>
    %cst_12 = arith.constant dense<0.000000e+00> : vector<8x128xf32>
    %23 = tpu.matmul %21, %22, %cst_12 {dimension_numbers = #tpu.dot_dimension_numbers<[1], [0], [0], [1], [0, 0, 1, 1], [], []>} : vector<8x128xf32>, vector<128x128xf32>, vector<8x128xf32> -> vector<8x128xf32>
    %c1299 = arith.constant 1299 : index
    %c0_13 = arith.constant 0 : index
    %24 = vector.load %arg3[%c1299, %c0_13] : memref<1312x128xf32, #tpu.memory_space<vmem>>, vector<1x128xf32>
    %25 = vector.broadcast %24 : vector<1x128xf32> to vector<8x128xf32>
    %26 = arith.addf %23, %25 : vector<8x128xf32>
    %27 = arith.addf %7, %26 : vector<8x128xf32>
    %c272 = arith.constant 272 : index
    %c0_14 = arith.constant 0 : index
    %28 = vector.load %arg3[%c272, %c0_14] : memref<1312x128xf32, #tpu.memory_space<vmem>>, vector<128x128xf32>
    %cst_15 = arith.constant dense<0.000000e+00> : vector<8x128xf32>
    %29 = tpu.matmul %27, %28, %cst_15 {dimension_numbers = #tpu.dot_dimension_numbers<[1], [0], [0], [1], [0, 0, 1, 1], [], []>} : vector<8x128xf32>, vector<128x128xf32>, vector<8x128xf32> -> vector<8x128xf32>
    %c1300 = arith.constant 1300 : index
    %c0_16 = arith.constant 0 : index
    %30 = vector.load %arg3[%c1300, %c0_16] : memref<1312x128xf32, #tpu.memory_space<vmem>>, vector<1x128xf32>
    %31 = vector.broadcast %30 : vector<1x128xf32> to vector<8x128xf32>
    %32 = arith.addf %29, %31 : vector<8x128xf32>
    %cst_17 = arith.constant 0.000000e+00 : f32
    %33 = vector.broadcast %cst_17 : f32 to vector<8x128xf32>
    %34 = arith.cmpf ogt, %32, %33 : vector<8x128xf32>
    %cst_18 = arith.constant 1.000000e-01 : f32
    %35 = vector.broadcast %cst_18 : f32 to vector<8x128xf32>
    %36 = arith.mulf %35, %32 : vector<8x128xf32>
    %37 = arith.select %34, %32, %36 : vector<8x128xi1>, vector<8x128xf32>
    %c400 = arith.constant 400 : index
    %c0_19 = arith.constant 0 : index
    %38 = vector.load %arg3[%c400, %c0_19] : memref<1312x128xf32, #tpu.memory_space<vmem>>, vector<128x128xf32>
    %cst_20 = arith.constant dense<0.000000e+00> : vector<8x128xf32>
    %39 = tpu.matmul %37, %38, %cst_20 {dimension_numbers = #tpu.dot_dimension_numbers<[1], [0], [0], [1], [0, 0, 1, 1], [], []>} : vector<8x128xf32>, vector<128x128xf32>, vector<8x128xf32> -> vector<8x128xf32>
    %c1301 = arith.constant 1301 : index
    %c0_21 = arith.constant 0 : index
    %40 = vector.load %arg3[%c1301, %c0_21] : memref<1312x128xf32, #tpu.memory_space<vmem>>, vector<1x128xf32>
    %41 = vector.broadcast %40 : vector<1x128xf32> to vector<8x128xf32>
    %42 = arith.addf %39, %41 : vector<8x128xf32>
    %c784 = arith.constant 784 : index
    %c0_22 = arith.constant 0 : index
    %43 = vector.load %arg3[%c784, %c0_22] : memref<1312x128xf32, #tpu.memory_space<vmem>>, vector<128x128xf32>
    %cst_23 = arith.constant dense<0.000000e+00> : vector<8x128xf32>
    %44 = tpu.matmul %7, %43, %cst_23 {dimension_numbers = #tpu.dot_dimension_numbers<[1], [0], [0], [1], [0, 0, 1, 1], [], []>} : vector<8x128xf32>, vector<128x128xf32>, vector<8x128xf32> -> vector<8x128xf32>
    %45 = arith.addf %42, %44 : vector<8x128xf32>
    %c1304 = arith.constant 1304 : index
    %c0_24 = arith.constant 0 : index
    %46 = vector.load %arg3[%c1304, %c0_24] : memref<1312x128xf32, #tpu.memory_space<vmem>>, vector<1x128xf32>
    %47 = vector.broadcast %46 : vector<1x128xf32> to vector<8x128xf32>
    %48 = arith.addf %45, %47 : vector<8x128xf32>
    %49 = arith.addf %27, %48 : vector<8x128xf32>
    %c528 = arith.constant 528 : index
    %c0_25 = arith.constant 0 : index
    %50 = vector.load %arg3[%c528, %c0_25] : memref<1312x128xf32, #tpu.memory_space<vmem>>, vector<128x128xf32>
    %cst_26 = arith.constant dense<0.000000e+00> : vector<8x128xf32>
    %51 = tpu.matmul %49, %50, %cst_26 {dimension_numbers = #tpu.dot_dimension_numbers<[1], [0], [0], [1], [0, 0, 1, 1], [], []>} : vector<8x128xf32>, vector<128x128xf32>, vector<8x128xf32> -> vector<8x128xf32>
    %c1302 = arith.constant 1302 : index
    %c0_27 = arith.constant 0 : index
    %52 = vector.load %arg3[%c1302, %c0_27] : memref<1312x128xf32, #tpu.memory_space<vmem>>, vector<1x128xf32>
    %53 = vector.broadcast %52 : vector<1x128xf32> to vector<8x128xf32>
    %54 = arith.addf %51, %53 : vector<8x128xf32>
    %cst_28 = arith.constant 0.000000e+00 : f32
    %55 = vector.broadcast %cst_28 : f32 to vector<8x128xf32>
    %56 = arith.cmpf ogt, %54, %55 : vector<8x128xf32>
    %cst_29 = arith.constant 1.000000e-01 : f32
    %57 = vector.broadcast %cst_29 : f32 to vector<8x128xf32>
    %58 = arith.mulf %57, %54 : vector<8x128xf32>
    %59 = arith.select %56, %54, %58 : vector<8x128xi1>, vector<8x128xf32>
    %c656 = arith.constant 656 : index
    %c0_30 = arith.constant 0 : index
    %60 = vector.load %arg3[%c656, %c0_30] : memref<1312x128xf32, #tpu.memory_space<vmem>>, vector<128x128xf32>
    %cst_31 = arith.constant dense<0.000000e+00> : vector<8x128xf32>
    %61 = tpu.matmul %59, %60, %cst_31 {dimension_numbers = #tpu.dot_dimension_numbers<[1], [0], [0], [1], [0, 0, 1, 1], [], []>} : vector<8x128xf32>, vector<128x128xf32>, vector<8x128xf32> -> vector<8x128xf32>
    %c1303 = arith.constant 1303 : index
    %c0_32 = arith.constant 0 : index
    %62 = vector.load %arg3[%c1303, %c0_32] : memref<1312x128xf32, #tpu.memory_space<vmem>>, vector<1x128xf32>
    %63 = vector.broadcast %62 : vector<1x128xf32> to vector<8x128xf32>
    %64 = arith.addf %61, %63 : vector<8x128xf32>
    %c912 = arith.constant 912 : index
    %c0_33 = arith.constant 0 : index
    %65 = vector.load %arg3[%c912, %c0_33] : memref<1312x128xf32, #tpu.memory_space<vmem>>, vector<128x128xf32>
    %cst_34 = arith.constant dense<0.000000e+00> : vector<8x128xf32>
    %66 = tpu.matmul %7, %65, %cst_34 {dimension_numbers = #tpu.dot_dimension_numbers<[1], [0], [0], [1], [0, 0, 1, 1], [], []>} : vector<8x128xf32>, vector<128x128xf32>, vector<8x128xf32> -> vector<8x128xf32>
    %67 = arith.addf %64, %66 : vector<8x128xf32>
    %c1305 = arith.constant 1305 : index
    %c0_35 = arith.constant 0 : index
    %68 = vector.load %arg3[%c1305, %c0_35] : memref<1312x128xf32, #tpu.memory_space<vmem>>, vector<1x128xf32>
    %69 = vector.broadcast %68 : vector<1x128xf32> to vector<8x128xf32>
    %70 = arith.addf %67, %69 : vector<8x128xf32>
    %71 = arith.addf %49, %70 : vector<8x128xf32>
    %c1040 = arith.constant 1040 : index
    %c0_36 = arith.constant 0 : index
    %72 = vector.load %arg3[%c1040, %c0_36] : memref<1312x128xf32, #tpu.memory_space<vmem>>, vector<128x128xf32>
    %cst_37 = arith.constant dense<0.000000e+00> : vector<8x128xf32>
    %73 = tpu.matmul %71, %72, %cst_37 {dimension_numbers = #tpu.dot_dimension_numbers<[1], [0], [0], [1], [0, 0, 1, 1], [], []>} : vector<8x128xf32>, vector<128x128xf32>, vector<8x128xf32> -> vector<8x128xf32>
    %c1306 = arith.constant 1306 : index
    %c0_38 = arith.constant 0 : index
    %74 = vector.load %arg3[%c1306, %c0_38] : memref<1312x128xf32, #tpu.memory_space<vmem>>, vector<1x128xf32>
    %75 = vector.broadcast %74 : vector<1x128xf32> to vector<8x128xf32>
    %76 = arith.addf %73, %75 : vector<8x128xf32>
    %c1168 = arith.constant 1168 : index
    %c0_39 = arith.constant 0 : index
    %77 = vector.load %arg3[%c1168, %c0_39] : memref<1312x128xf32, #tpu.memory_space<vmem>>, vector<128x128xf32>
    %cst_40 = arith.constant dense<0.000000e+00> : vector<8x128xf32>
    %78 = tpu.matmul %11, %77, %cst_40 {dimension_numbers = #tpu.dot_dimension_numbers<[1], [0], [0], [1], [0, 0, 1, 1], [], []>} : vector<8x128xf32>, vector<128x128xf32>, vector<8x128xf32> -> vector<8x128xf32>
    %79 = vector.shape_cast %76 : vector<8x128xf32> to vector<8x1x128xf32>
    %80 = vector.shape_cast %78 : vector<8x128xf32> to vector<1x8x128xf32>
    %81 = vector.broadcast %79 : vector<8x1x128xf32> to vector<8x8x128xf32>
    %82 = vector.broadcast %80 : vector<1x8x128xf32> to vector<8x8x128xf32>
    %83 = arith.addf %81, %82 : vector<8x8x128xf32>
    %cst_41 = arith.constant 0.000000e+00 : f32
    %84 = vector.broadcast %cst_41 : f32 to vector<8x8x128xf32>
    %85 = arith.cmpf ogt, %83, %84 : vector<8x8x128xf32>
    %cst_42 = arith.constant 1.000000e-01 : f32
    %86 = vector.broadcast %cst_42 : f32 to vector<8x8x128xf32>
    %87 = arith.mulf %86, %83 : vector<8x8x128xf32>
    %88 = arith.select %85, %83, %87 : vector<8x8x128xi1>, vector<8x8x128xf32>
    %c1307 = arith.constant 1307 : index
    %c0_43 = arith.constant 0 : index
    %89 = vector.load %arg3[%c1307, %c0_43] : memref<1312x128xf32, #tpu.memory_space<vmem>>, vector<1x128xf32>
    %90 = vector.shape_cast %89 : vector<1x128xf32> to vector<1x1x128xf32>
    %91 = vector.broadcast %90 : vector<1x1x128xf32> to vector<8x8x128xf32>
    %92 = arith.mulf %88, %91 : vector<8x8x128xf32>
    %cst_44 = arith.constant dense<0.000000e+00> : vector<8x8xf32>
    %93 = vector.multi_reduction <add>, %92, %cst_44 [2] : vector<8x8x128xf32> to vector<8x8xf32>
    %c1 = arith.constant 1 : index
    %94 = memref.load %arg1[%c1] : memref<2xf32, #tpu.memory_space<smem>>
    %95 = vector.broadcast %94 : f32 to vector<8x8xf32>
    %96 = arith.addf %93, %95 : vector<8x8xf32>
    %cst_45 = arith.constant -1.000000e+01 : f32
    %cst_46 = arith.constant 1.000000e+01 : f32
    %97 = vector.broadcast %cst_45 : f32 to vector<8x8xf32>
    %98 = arith.maximumf %97, %96 : vector<8x8xf32>
    %99 = vector.broadcast %cst_46 : f32 to vector<8x8xf32>
    %100 = arith.minimumf %99, %98 : vector<8x8xf32>
    %cst_47 = arith.constant dense<0xFF800000> : vector<8xf32>
    %101 = vector.multi_reduction <maximumf>, %100, %cst_47 [1] : vector<8x8xf32> to vector<8xf32>
    %102 = vector.shape_cast %101 : vector<8xf32> to vector<8x1xf32>
    %103 = vector.broadcast %102 : vector<8x1xf32> to vector<8x8xf32>
    %104 = arith.subf %100, %103 : vector<8x8xf32>
    %c0_48 = arith.constant 0 : index
    %105 = memref.load %arg1[%c0_48] : memref<2xf32, #tpu.memory_space<smem>>
    %106 = vector.broadcast %105 : f32 to vector<8x8xf32>
    %107 = arith.mulf %104, %106 : vector<8x8xf32>
    %108 = math.exp %107 : vector<8x8xf32>
    %cst_49 = arith.constant dense<0.000000e+00> : vector<8xf32>
    %109 = vector.multi_reduction <add>, %108, %cst_49 [1] : vector<8x8xf32> to vector<8xf32>
    %110 = vector.shape_cast %109 : vector<8xf32> to vector<8x1xf32>
    %111 = vector.broadcast %110 : vector<8x1xf32> to vector<8x8xf32>
    %112 = arith.divf %108, %111 : vector<8x8xf32>
    %cst_50 = arith.constant 9.99999997E-7 : f32
    %cst_51 = arith.constant 0.999998986 : f32
    %113 = vector.broadcast %cst_50 : f32 to vector<8x8xf32>
    %114 = arith.maximumf %113, %112 : vector<8x8xf32>
    %115 = vector.broadcast %cst_51 : f32 to vector<8x8xf32>
    %116 = arith.minimumf %115, %114 : vector<8x8xf32>
    %cst_52 = arith.constant 0.000000e+00 : f32
    %117 = vector.broadcast %cst_52 : f32 to vector<8x120xf32>
    %118 = tpu.concatenate %116, %117 in 1 : vector<8x8xf32>, vector<8x120xf32> -> vector<8x128xf32>
    %c0_53 = arith.constant 0 : index
    %c0_54 = arith.constant 0 : index
    %c0_55 = arith.constant 0 : index
    %119 = vector.load %arg4[%c0_53, %c0_54, %c0_55] : memref<1x8x128xf32, #tpu.memory_space<vmem>>, vector<1x8x128xf32>
    %120 = vector.shape_cast %119 : vector<1x8x128xf32> to vector<8x128xf32>
    %121 = vector.shape_cast %118 : vector<8x128xf32> to vector<1x8x128xf32>
    tpu.vector_store %arg4[%c0_53, %c0_54, %c0_55], %121 {strides = array<i32>} : memref<1x8x128xf32, #tpu.memory_space<vmem>>, vector<1x8x128xf32>,
    return
  }
  func.func @transform_0(%arg0: i32) -> i32 {
    %c0_i32 = arith.constant 0 : i32
    %c0_i32_0 = arith.constant 0 : i32
    return %c0_i32 : i32
  }
  func.func @transform_1(%arg0: i32) -> (i32, i32, i32) {
    %c0_i32 = arith.constant 0 : i32
    %c0_i32_0 = arith.constant 0 : i32
    %c0_i32_1 = arith.constant 0 : i32
    return %arg0, %c0_i32, %c0_i32_0 : i32, i32, i32
  }
  func.func @transform_2(%arg0: i32) -> (i32, i32) {
    %c0_i32 = arith.constant 0 : i32
    %c0_i32_0 = arith.constant 0 : i32
    %c0_i32_1 = arith.constant 0 : i32
    return %c0_i32, %c0_i32_0 : i32, i32
  }
  func.func @transform_3(%arg0: i32) -> (i32, i32, i32) {
    %c0_i32 = arith.constant 0 : i32
    %c0_i32_0 = arith.constant 0 : i32
    %c0_i32_1 = arith.constant 0 : i32
    return %arg0, %c0_i32, %c0_i32_0 : i32, i32, i32
  }
}

</mosaic_0001>

<bundles_post_ra>
// kernel: tpu_custom_call.1
= control target key start
LH: loop header
LB: loop body
LE: loop exit
PB: predicated region body
PF: predicated region fallthrough
CT: control target
= control target key end

     0   :  { %8 = vsyncpa [#allocation5], 0  ;;  %s3254_s0 = inlined_call_operand.hbm [shape: f32[2], index: 0, kind: input, shape index: {}]   ;;  %s3255_s1 = inlined_call_operand.hbm [shape: f32[4,16,16], index: 1, kind: input, shape index: {}]   ;;  %s3256_s2 = inlined_call_operand.hbm [shape: f32[1312,128], index: 2, kind: input, shape index: {}]   ;;  %s3257_s3 = inlined_call_operand.hbm [shape: f32[4,8,128], index: 3, kind: output, shape index: {}]  }
   0x1   :  { %9 = vsyncpa [#allocation3], 0 }
   0x2   :  { %11 = vsyncpa [#allocation3 + $0x1], 0 }
   0x3   :  { %12 = vsyncpa [#allocation8], 0 }
   0x4   :  { %13 = vsyncpa [#allocation4], 0 }
   0x5   :  { %15 = vsyncpa [#allocation4 + $0x1], 0  ;;  %s2724_s12 = smov 0   ;;  %s2726_s13 = smov 0  }
   0x6   :  { %s2728_s14 = smov 0   ;;  %s2730_s15 = smov 0  }
   0x7 LB: > { %s2745_s16 = sadd.s32 4294967295, %s2692_s15   ;;  %s1876_s17 = sadd.s32 4294967294, %s2692_s15   ;;  %s2692_s15 = sphi %s2730_s15, %s3279_s15   ;;  %s2688_s14 = sphi %s2728_s14, %s3278_s14   ;;  %s2684_s13 = sphi %s2726_s13, %s3277_s13   ;;  %s2680_s12 = sphi %s2724_s12, %s3276_s12  }
   0x8   : > { %s2749_s18 = sadd.s32 1, %s2692_s15   ;;  %s49_s19 = sadd.s32 1, %s2688_s14 }
   0x9   : > { %s46_s20 = ssub.s32 %s2692_s15, %s2749_s18  ;;  %p56_p0 = scmp.ne.s32.totalorder %s2688_s14, %s2684_s13 }
   0xa   : > { %p47_p1 = scmp.eq.s32.totalorder %s46_s20, 0  ;;  %p57_p2 = scmp.eq.s32.totalorder %s2692_s15, 0 }
   0xb   : > { %p62_p3 = scmp.ne.s32.totalorder %s2684_s13, %s2680_s12  ;;  %p3259_p4 = scmp.eq.s32.totalorder %s2745_s16, 0 }
   0xc   : > { %s2761_s21 = scalar_select %p47_p1, %s2688_s14, %s49_s19  }
   0xd   : > { %p58_p5 = por %p57_p2, %p56_p0  ;;  %p2765_p6 = por %p3259_p4, %p62_p3 }
   0xe   : > { %p107_p7 = scmp.eq.s32.totalorder %s2745_s16, 3  ;;  %p113_p8 = scmp.eq.s32.totalorder %s1876_s17, 3 }
   0xf   : > { %s3262_s22 = scalar_select %p2765_p6, 1, 0 }
  0x10   : > { %p1877_p9 = scmp.ge.s32.totalorder %s2692_s15, 1  ;;  %p120_p10 = scmp.lt.s32.totalorder %s2692_s15, 5 }
  0x11   : > { %p2772_p11 = por %p107_p7, %p56_p0  ;;  %p2776_p12 = por %p113_p8, %p62_p3 }
  0x12   : > { %p2780_p13 = pnand %p1877_p9, %p120_p10  ;;  %p2477_p2 = scmp.lt.s32.totalorder %s2692_s15, 4 }
  0x13   : > { %s3263_s23 = scalar_select %p2772_p11, 1, 0 }
  0x14   : > { %s3264_s24 = scalar_select %p2776_p12, 1, 0 }
  0x15   : > { %s3265_s25 = scalar_select %p2780_p13, 1, 0 }
  0x16   : > { %p2460_p1 = pneg %p2780_p13  ;;  %p2793_p0 = pnand %p2477_p2, %p58_p5 }
  0x17   : > { %s2694_s28 = smov [#allocation7]   ;;  %s2695_s30 = smov [#allocation2]  }
  0x18   : > { %p2789_p6 = pnand %p2460_p1, %p3259_p4  ;;  %s141_s29 = sshll.u32 %s2694_s28, 4  ;;  %s142_s29 = int_to_ptr.vmem [resolvable:$true] %s141_s29 }
  0x19   : > { %s155_s6 = sand.u32 1, %s2688_s14   ;;  %s2577_s7 = scalar_lea.vmem %s142_s29, 20992 }
  0x1a   : > { %2463 = dma.hbm_to_smem (!%p2789_p6), %s3254_s0, 16, %s2695_s30, [#allocation5]  }
  0x1b   : > { %p2568_p3 = pneg %p2789_p6  ;;  %p2578_p7 = scmp.ne.s32.totalorder %s142_s29, %s2577_s7 }
  0x1c   : > { %p2585_p5 = scmp.lt.s32.totalorder %s142_s29, %s142_s29  ;;  %p2586_p10 = scmp.lt.s32.totalorder %s2577_s7, %s2577_s7 }
  0x1d   : > { %p2580_p8 = pnand %p2578_p7, %p2568_p3 }
  0x1e   : > { %p2587_p1 = por %p2586_p10, %p2585_p5 }
  0x1f   : > { %p2581_p9 = pneg %p2580_p8 }
  0x21   : > { %p2588_p2 = pnand %p2587_p1, %p2581_p9 }
  0x23   : > { %2591 = shalt.err (!%p2588_p2)
}
  0x24   : > { %s2696_s8 = smov 128   ;;  %s2697_s9 = smov 8  }
  0x25   : > { %2466 = dma.hbm_to_vmem [thread:$0]  (!%p2789_p6), %s3256_s2, 20992, %s142_s29, [#allocation8], %s2696_s8, %s2696_s8, %s2697_s9  }
  0x26   : > { %s1881_s17 = sshll.u32 %s155_s6, 4  ;;  %s1916_s19 = sshll.u32 %s2692_s15, 8 }
  0x27   : > { %s2817_s30 = scalar_lea.hbm %s3255_s1, %s1916_s19  ;;  %s159_s4 = scalar_lea.vmem [#allocation6], %s1881_s17 }
  0x28   : > { %s166_s5 = sshll.u32 %s159_s4, 4  ;;  %s2821_s26 = scalar_lea.sflag [#allocation3], %s155_s6  ;;  %s2819_s5 = int_to_ptr.vmem [resolvable:$true] %s166_s5 }
  0x29   : > { %s2592_s7 = scalar_lea.hbm %s2817_s30, 256  ;;  %p2594_p6 = pneg %p2793_p0 }
  0x2a   : > { %p2593_p3 = scmp.ne.s32.totalorder %s2817_s30, %s2592_s7  ;;  %s2597_s11 = scalar_lea.hbm %s3255_s1, 1024 }
  0x2b   : > { %p2598_p9 = scmp.lt.s32.totalorder %s2817_s30, %s3255_s1  ;;  %p2599_p5 = scmp.lt.s32.totalorder %s2597_s11, %s2592_s7 }
  0x2c   : > { %p2595_p7 = pnand %p2594_p6, %p2593_p3 }
  0x2d   : > { %p2600_p10 = por %p2599_p5, %p2598_p9 }
  0x2e   : > { %p2596_p8 = pneg %p2595_p7 }
  0x30   : > { %p2601_p1 = pnand %p2600_p10, %p2596_p8 }
  0x32   : > { %2604 = shalt.err (!%p2601_p1)
}
  0x33   : > { %s2605_s6 = scalar_lea.vmem %s2819_s5, 256  ;;  %s2698_s17 = smov [#allocation6]  }
  0x34   : > { %p2606_p2 = scmp.ne.s32.totalorder %s2819_s5, %s2605_s6  ;;  %s2610_s28 = sshll.u32 %s2698_s17, 4  ;;  %s2611_s28 = int_to_ptr.vmem [resolvable:$false] %s2610_s28 }
  0x35   : > { %s2612_s4 = scalar_lea.vmem %s2611_s28, 512  ;;  %p2613_p7 = scmp.lt.s32.totalorder %s2819_s5, %s2611_s28 }
  0x36   : > { %p2608_p4 = pnand %p2606_p2, %p2594_p6  ;;  %p2614_p12 = scmp.lt.s32.totalorder %s2612_s4, %s2605_s6 }
  0x38   : > { %p2609_p3 = pneg %p2608_p4  ;;  %p2615_p11 = por %p2614_p12, %p2613_p7 }
  0x3a   : > { %p2616_p13 = pnand %p2615_p11, %p2609_p3 }
  0x3c   : > { %2619 = shalt.err (!%p2616_p13)
}
  0x3d   : > { %2470 = dma.hbm_to_vmem [thread:$0]  (!%p2793_p0), %s2817_s30, 256, %s2819_s5, %s2821_s26, %s2696_s8, %s2696_s8, %s2697_s9  }
  0x3e   : > { %p3268_p4 = scmp.ne.s32.totalorder %s3265_s25, 0 }
  0x3f   : > { %p3269_p6 = scmp.eq.s32.totalorder (!%p3268_p4), %s2745_s16, 0 }
  0x40   : > { %178 = sbr.rel (%p3268_p4) target bundleno = 2484 (0x9b4), region = 32 }
  0x45   : > { %2663 = dma.done.wait (%p3269_p6), [#allocation5], 16   ;;  %p3270_p8 = pmov %p3269_p6 }
  0x46   : > { %s2852_s7 = sand.u32 1, %s2684_s13   ;;  %p3271_p11 = scmp.ne.s32.totalorder %s3262_s22, 0 }
  0x47   : > { %2665 = vsyncadd (%p3270_p8), [#allocation5], 4294967280  ;;  %s1886_s27 = sshll.u32 %s2852_s7, 4  ;;  %s185_s29 = scalar_lea.sflag [#allocation3], %s2852_s7 }
  0x48   : > { %s188_s10 = scalar_lea.vmem [#allocation6], %s1886_s27 }
  0x49   : > { %2667 = dma.done.wait (%p3271_p11), %s185_s29, 256  }
  0x4a   : > { %2669 = vsyncadd (%p3271_p11), %s185_s29, 4294967040  ;;  %p3272_p12 = pmov %p3269_p6 }
  0x4b   : > { %p3273_p13 = pmov %p3269_p6 }
  0x4c   : > { %2671 = dma.done.wait (%p3272_p12), [#allocation8], 20992  }
  0x4d   : > { %2673 = vsyncadd (%p3273_p13), [#allocation8], 4294946304 }
  0x4e   : > { %197 = sfence }
  0x4f   : > { %v219_v0 = vld [vmem:[#allocation7 + $0x8] sm:$0xff]  ;;  %v218_v1 = vld [vmem:[#allocation7] sm:$0xff]  ;;  %vm220_vm0 = vcmask 130048   ;;  %v2699_v5 = vmov 0.0   ;;  %v327_v7 = vld [vmem:[#allocation7 + $0x78] sm:$0xff]  ;;  %vm2700_vm1 = vmmov 0  }
  0x50   : > { %v216_v2 = vld [vmem:[%s188_s10] sm:$0xff]  ;;  %2091 = vmatprep.subr.mxu0 %v219_v0  ;;  %v329_v3 = vld [vmem:[#allocation7 + $0x88] sm:$0xff]  ;;  %2098 = vmatprep.subr.mxu1 %v2699_v5  ;;  %v323_v11 = vld [vmem:[#allocation7 + $0x58] sm:$0xff]  ;;  %s1903_s22 = sld [smem:[#allocation2 + $0x1]]  ;;  %vm1454_vm13 = vcmask 1041409   ;;  %vm1456_vm14 = vcmask 1042434  }
  0x51   : > { %2095 = vmatprep.mubr.msk.f32.mxu0 %vm220_vm0, %v216_v2  ;;  %2092 = vmatpush3.msra.mxu0 %v219_v0  ;;  %v217_v4 = vld [vmem:[%s188_s10 + $0x8] sm:$0xff]  ;;  %v328_v6 = vld [vmem:[#allocation7 + $0x80] sm:$0xff]  ;;  %v326_v8 = vld [vmem:[#allocation7 + $0x70] sm:$0xff]  ;;  %vm1458_vm15 = vcmask 1043459   ;;  %s1522_s25 = sld [smem:[#allocation2]]  ;;  %s1888_s8 = sshll.u32 %s2852_s7, 3 }
  0x52   : > { %2093 = vmatprep.subr.mxu0 %v218_v1  ;;  %2099 = vmatpush3.msra.mxu1 %v329_v3  ;;  %v325_v9 = vld [vmem:[#allocation7 + $0x68] sm:$0xff]  ;;  %v324_v10 = vld [vmem:[#allocation7 + $0x60] sm:$0xff]  ;;  %v322_v12 = vld [vmem:[#allocation7 + $0x50] sm:$0xff]  ;;  %s1913_s9 = sshll.u32 %s2745_s16, 7  ;;  %s215_s30 = scalar_lea.vmem [#allocation9], %s1888_s8 }
  0x53   : > { %2094 = vmatpush3.msra.mxu0 %v218_v1  ;;  %2100 = vmatprep.subr.mxu1 %v2699_v5  ;;  %v321_v13 = vld [vmem:[#allocation7 + $0x48] sm:$0xff]  ;;  %v320_v14 = vld [vmem:[#allocation7 + $0x40] sm:$0xff]  ;;  %v319_v15 = vld [vmem:[#allocation7 + $0x38] sm:$0xff]  ;;  %s1784_s5 = sshll.u32 %s215_s30, 4  ;;  %s3217_s19 = scalar_lea.hbm %s3257_s3, %s1913_s9  ;;  %s1785_s5 = int_to_ptr.vmem [resolvable:$true] %s1784_s5 }
  0x54   : > { %2096 = vmatmul.mubr.msk.f32.vlgmr.msra.gmra.mxu0 %vm220_vm0, %v217_v4  ;;  %2101 = vmatpush3.msra.mxu1 %v328_v6  ;;  %v318_v16 = vld [vmem:[#allocation7 + $0x30] sm:$0xff]  ;;  %v317_v17 = vld [vmem:[#allocation7 + $0x28] sm:$0xff]  ;;  %v316_v18 = vld [vmem:[#allocation7 + $0x20] sm:$0xff]  ;;  %vm1460_vm0 = vcmask 1044484   ;;  %s1771_s16 = scalar_lea.sflag [#allocation4], %s2852_s7  ;;  %s2620_s20 = scalar_lea.vmem %s1785_s5, 128 }
  0x55   : > { %2102 = vmatprep.subr.mxu1 %v2699_v5  ;;  %2133 = vmatprep.subr.mxu0 %v2699_v5  ;;  %v315_v19 = vld [vmem:[#allocation7 + $0x18] sm:$0xff]  ;;  %v314_v20 = vld [vmem:[#allocation7 + $0x10] sm:$0xff]  ;;  %v423_v21 = vld [vmem:[#allocation7 + $0x108] sm:$0xff]  ;;  %p2621_p0 = scmp.ne.s32.totalorder %s1785_s5, %s2620_s20  ;;  %p3274_p9 = scmp.ne.s32.totalorder %s3263_s23, 0 }
  0x56   : > { %2103 = vmatpush3.msra.mxu1 %v327_v7  ;;  %2130 = vmatprep.mubr.msk.f32.mxu1 %vm2700_vm1, %v2699_v5  ;;  %v422_v22 = vld [vmem:[#allocation7 + $0x100] sm:$0xff]  ;;  %v421_v23 = vld [vmem:[#allocation7 + $0xf8] sm:$0xff]  ;;  %v420_v24 = vld [vmem:[#allocation7 + $0xf0] sm:$0xff]  ;;  %s2703_s6 = smov [#allocation9]  }
  0x57   : > { %2104 = vmatprep.subr.mxu1 %v2699_v5  ;;  %2165 = vmatprep.mubr.msk.f32.mxu0 %vm2700_vm1, %v2699_v5  ;;  %v419_v25 = vld [vmem:[#allocation7 + $0xe8] sm:$0xff]  ;;  %v418_v26 = vld [vmem:[#allocation7 + $0xe0] sm:$0xff]  ;;  %v417_v27 = vld [vmem:[#allocation7 + $0xd8] sm:$0xff]  ;;  %p2622_p5 = pnand %p2621_p0, %p3274_p9  ;;  %s2624_s17 = sshll.u32 %s2703_s6, 4  ;;  %s2625_s17 = int_to_ptr.vmem [resolvable:$false] %s2624_s17 }
  0x58   : > { %2105 = vmatpush3.msra.mxu1 %v326_v8  ;;  %2134 = vmatpush3.msra.mxu0 %v423_v21  ;;  %v416_v28 = vld [vmem:[#allocation7 + $0xd0] sm:$0xff]  ;;  %v415_v29 = vld [vmem:[#allocation7 + $0xc8] sm:$0xff]  ;;  %v414_v30 = vld [vmem:[#allocation7 + $0xc0] sm:$0xff]  ;;  %s2626_s28 = scalar_lea.vmem %s2625_s17, 256  ;;  %p2627_p1 = scmp.lt.s32.totalorder %s1785_s5, %s2625_s17 }
  0x59   : > { %2106 = vmatprep.subr.mxu1 %v2699_v5  ;;  %2135 = vmatprep.subr.mxu0 %v2699_v5  ;;  %v413_v31 = vld [vmem:[#allocation7 + $0xb8] sm:$0xff]  ;;  %v412_v32 = vld [vmem:[#allocation7 + $0xb0] sm:$0xff]  ;;  %v411_v33 = vld [vmem:[#allocation7 + $0xa8] sm:$0xff]  ;;  %p2623_p10 = pneg %p2622_p5  ;;  %p2628_p2 = scmp.lt.s32.totalorder %s2626_s28, %s2620_s20 }
  0x5a   : > { %2107 = vmatpush3.msra.mxu1 %v325_v9  ;;  %2136 = vmatpush3.msra.mxu0 %v422_v22  ;;  %v1891_v35 = vld [vmem:[#allocation7 + $0x510] ss:$0 sm:$0xff]  ;;  %v410_v38 = vld [vmem:[#allocation7 + $0xa0] sm:$0xff]  ;;  %v409_v39 = vld [vmem:[#allocation7 + $0x98] sm:$0xff] }
  0x5b   : > { %2108 = vmatprep.subr.mxu1 %v2699_v5  ;;  %2137 = vmatprep.subr.mxu0 %v2699_v5  ;;  %v408_v40 = vld [vmem:[#allocation7 + $0x90] sm:$0xff]  ;;  %v515_v41 = vld [vmem:[#allocation7 + $0x188] sm:$0xff]  ;;  %v514_v42 = vld [vmem:[#allocation7 + $0x180] sm:$0xff]  ;;  %p2629_p3 = por %p2628_p2, %p2627_p1 }
  0x5c   : > { %2109 = vmatpush3.msra.mxu1 %v324_v10  ;;  %2138 = vmatpush3.msra.mxu0 %v421_v23  ;;  %v513_v43 = vld [vmem:[#allocation7 + $0x178] sm:$0xff]  ;;  %v512_v44 = vld [vmem:[#allocation7 + $0x170] sm:$0xff]  ;;  %v511_v45 = vld [vmem:[#allocation7 + $0x168] sm:$0xff] }
  0x5d   : > { %2110 = vmatprep.subr.mxu1 %v2699_v5  ;;  %2139 = vmatprep.subr.mxu0 %v2699_v5  ;;  %v510_v46 = vld [vmem:[#allocation7 + $0x160] sm:$0xff]  ;;  %v509_v47 = vld [vmem:[#allocation7 + $0x158] sm:$0xff]  ;;  %v508_v48 = vld [vmem:[#allocation7 + $0x150] sm:$0xff]  ;;  %p2630_p7 = pnand %p2629_p3, %p2623_p10 }
  0x5e   : > { %2111 = vmatpush3.msra.mxu1 %v323_v11  ;;  %2140 = vmatpush3.msra.mxu0 %v420_v24  ;;  %v507_v49 = vld [vmem:[#allocation7 + $0x148] sm:$0xff]  ;;  %v506_v50 = vld [vmem:[#allocation7 + $0x140] sm:$0xff]  ;;  %v505_v51 = vld [vmem:[#allocation7 + $0x138] sm:$0xff] }
  0x5f   : > { %2112 = vmatprep.subr.mxu1 %v2699_v5  ;;  %2141 = vmatprep.subr.mxu0 %v2699_v5  ;;  %v504_v52 = vld [vmem:[#allocation7 + $0x130] sm:$0xff]  ;;  %v503_v53 = vld [vmem:[#allocation7 + $0x128] sm:$0xff]  ;;  %v502_v54 = vld [vmem:[#allocation7 + $0x120] sm:$0xff] }
  0x60   : > { %2113 = vmatpush3.msra.mxu1 %v322_v12  ;;  %2142 = vmatpush3.msra.mxu0 %v419_v25  ;;  %v1893_v55 = vld [vmem:[#allocation7 + $0x512] ss:$0 sm:$0xff]  ;;  %v501_v61 = vld [vmem:[#allocation7 + $0x118] sm:$0xff]  ;;  %v609_v63 = vld [vmem:[#allocation7 + $0x208] sm:$0xff] }
  0x61   : > { %2114 = vmatprep.subr.mxu1 %v2699_v5  ;;  %2143 = vmatprep.subr.mxu0 %v2699_v5  ;;  %v500_v62 = vld [vmem:[#allocation7 + $0x110] sm:$0xff]  ;;  %v608_v0 = vld [vmem:[#allocation7 + $0x200] sm:$0xff]  ;;  %v607_v1 = vld [vmem:[#allocation7 + $0x1f8] sm:$0xff] }
  0x62   : > { %2115 = vmatpush3.msra.mxu1 %v321_v13  ;;  %2144 = vmatpush3.msra.mxu0 %v418_v26  ;;  %v606_v2 = vld [vmem:[#allocation7 + $0x1f0] sm:$0xff]  ;;  %v605_v3 = vld [vmem:[#allocation7 + $0x1e8] sm:$0xff]  ;;  %v604_v4 = vld [vmem:[#allocation7 + $0x1e0] sm:$0xff] }
  0x63   : > { %2116 = vmatprep.subr.mxu1 %v2699_v5  ;;  %2145 = vmatprep.subr.mxu0 %v2699_v5  ;;  %v603_v6 = vld [vmem:[#allocation7 + $0x1d8] sm:$0xff]  ;;  %v602_v7 = vld [vmem:[#allocation7 + $0x1d0] sm:$0xff]  ;;  %v601_v8 = vld [vmem:[#allocation7 + $0x1c8] sm:$0xff] }
  0x64   : > { %2117 = vmatpush3.msra.mxu1 %v320_v14  ;;  %2146 = vmatpush3.msra.mxu0 %v417_v27  ;;  %v600_v9 = vld [vmem:[#allocation7 + $0x1c0] sm:$0xff]  ;;  %v599_v10 = vld [vmem:[#allocation7 + $0x1b8] sm:$0xff]  ;;  %v598_v11 = vld [vmem:[#allocation7 + $0x1b0] sm:$0xff] }
  0x65   : > { %2118 = vmatprep.subr.mxu1 %v2699_v5  ;;  %2147 = vmatprep.subr.mxu0 %v2699_v5  ;;  %v597_v12 = vld [vmem:[#allocation7 + $0x1a8] sm:$0xff]  ;;  %v1894_v13 = vld [vmem:[#allocation7 + $0x513] ss:$0 sm:$0xff]  ;;  %v695_v23 = vld [vmem:[#allocation7 + $0x360] sm:$0xff] }
  0x66   : > { %2119 = vmatpush3.msra.mxu1 %v319_v15  ;;  %2148 = vmatpush3.msra.mxu0 %v416_v28  ;;  %v697_v21 = vld [vmem:[#allocation7 + $0x370] sm:$0xff]  ;;  %v696_v22 = vld [vmem:[#allocation7 + $0x368] sm:$0xff]  ;;  %v694_v24 = vld [vmem:[#allocation7 + $0x358] sm:$0xff] }
  0x67   : > { %2120 = vmatprep.subr.mxu1 %v2699_v5  ;;  %2149 = vmatprep.subr.mxu0 %v2699_v5  ;;  %v693_v25 = vld [vmem:[#allocation7 + $0x350] sm:$0xff]  ;;  %v692_v26 = vld [vmem:[#allocation7 + $0x348] sm:$0xff]  ;;  %v691_v27 = vld [vmem:[#allocation7 + $0x340] sm:$0xff] }
  0x68   : > { %2121 = vmatpush3.msra.mxu1 %v318_v16  ;;  %2150 = vmatpush3.msra.mxu0 %v415_v29  ;;  %v690_v28 = vld [vmem:[#allocation7 + $0x338] sm:$0xff]  ;;  %v689_v29 = vld [vmem:[#allocation7 + $0x330] sm:$0xff] }
  0x69   : > { %2122 = vmatprep.subr.mxu1 %v2699_v5  ;;  %2151 = vmatprep.subr.mxu0 %v2699_v5 }
  0x6a   : > { %2123 = vmatpush3.msra.mxu1 %v317_v17  ;;  %2152 = vmatpush3.msra.mxu0 %v414_v30  ;;  %v688_v30 = vld [vmem:[#allocation7 + $0x328] sm:$0xff] }
  0x6b   : > { %2124 = vmatprep.subr.mxu1 %v2699_v5  ;;  %2153 = vmatprep.subr.mxu0 %v2699_v5 }
  0x6c   : > { %2125 = vmatpush3.msra.mxu1 %v316_v18  ;;  %2154 = vmatpush3.msra.mxu0 %v413_v31  ;;  %v700_v18 = vld [vmem:[#allocation7 + $0x388] sm:$0xff]  ;;  %v687_v31 = vld [vmem:[#allocation7 + $0x320] sm:$0xff] }
  0x6d   : > { %2126 = vmatprep.subr.mxu1 %v2699_v5  ;;  %2155 = vmatprep.subr.mxu0 %v2699_v5 }
  0x6e   : > { %2127 = vmatpush3.msra.mxu1 %v315_v19  ;;  %2156 = vmatpush3.msra.mxu0 %v412_v32  ;;  %v699_v19 = vld [vmem:[#allocation7 + $0x380] sm:$0xff]  ;;  %v686_v32 = vld [vmem:[#allocation7 + $0x318] sm:$0xff] }
  0x6f   : > { %2128 = vmatprep.subr.mxu1 %v2699_v5  ;;  %2157 = vmatprep.subr.mxu0 %v2699_v5 }
  0x70   : > { %2129 = vmatpush3.msra.mxu1 %v314_v20  ;;  %2158 = vmatpush3.msra.mxu0 %v411_v33  ;;  %v698_v20 = vld [vmem:[#allocation7 + $0x378] sm:$0xff]  ;;  %v685_v33 = vld [vmem:[#allocation7 + $0x310] sm:$0xff] }
  0x71   : > { %2168 = vmatprep.subr.mxu1 %v2699_v5  ;;  %2159 = vmatprep.subr.mxu0 %v2699_v5 }
  0x72   : > { %2160 = vmatpush3.msra.mxu0 %v410_v38  ;;  %v594_v38 = vld [vmem:[#allocation7 + $0x190] sm:$0xff] }
  0x73   : > { %2161 = vmatprep.subr.mxu0 %v2699_v5 }
  0x74   : > { %2162 = vmatpush3.msra.mxu0 %v409_v39  ;;  %v1895_v39 = vld [vmem:[#allocation7 + $0x514] ss:$0 sm:$0xff] }
  0x75   : > { %2163 = vmatprep.subr.mxu0 %v2699_v5 }
  0x76   : > { %2164 = vmatpush3.msra.mxu0 %v408_v40 }
  0x77   : > { %2203 = vmatprep.subr.mxu0 %v2699_v5 }
 0x114   : > { %v2899_v34 = vpop.f32.mrf.mxu0 }
 0x116   : > { %v293_v36 = vpop.f32.mrf.mxu0 }
 0x117   : > { %v2901_v37 = vadd.f32 %v1891_v35, %v293_v36  ;;  %v596_v35 = vld [vmem:[#allocation7 + $0x1a0] sm:$0xff]  ;;  %v595_v36 = vld [vmem:[#allocation7 + $0x198] sm:$0xff] }
 0x119   : > { %2131 = vmatmul.mubr.f32.vlgmr.msra.gmra.mxu1 %v2901_v37 }
 0x11a   : > { %2200 = vmatprep.mubr.msk.f32.mxu1 %vm2700_vm1, %v2699_v5  ;;  %2169 = vmatpush3.msra.mxu1 %v515_v41 }
 0x11b   : > { %2170 = vmatprep.subr.mxu1 %v2699_v5 }
 0x11c   : > { %2171 = vmatpush3.msra.mxu1 %v514_v42 }
 0x11d   : > { %2172 = vmatprep.subr.mxu1 %v2699_v5 }
 0x11e   : > { %2173 = vmatpush3.msra.mxu1 %v513_v43 }
 0x11f   : > { %2174 = vmatprep.subr.mxu1 %v2699_v5 }
 0x120   : > { %2175 = vmatpush3.msra.mxu1 %v512_v44  ;;  %v794_v44 = vld [vmem:[#allocation7 + $0x288] sm:$0xff] }
 0x121   : > { %2176 = vmatprep.subr.mxu1 %v2699_v5 }
 0x122   : > { %2177 = vmatpush3.msra.mxu1 %v511_v45 }
 0x123   : > { %2178 = vmatprep.subr.mxu1 %v2699_v5 }
 0x124   : > { %2179 = vmatpush3.msra.mxu1 %v510_v46  ;;  %v793_v46 = vld [vmem:[#allocation7 + $0x280] sm:$0xff] }
 0x125   : > { %2180 = vmatprep.subr.mxu1 %v2699_v5 }
 0x126   : > { %2181 = vmatpush3.msra.mxu1 %v509_v47  ;;  %v792_v47 = vld [vmem:[#allocation7 + $0x278] sm:$0xff] }
 0x127   : > { %2182 = vmatprep.subr.mxu1 %v2699_v5 }
 0x128   : > { %2183 = vmatpush3.msra.mxu1 %v508_v48  ;;  %v791_v48 = vld [vmem:[#allocation7 + $0x270] sm:$0xff] }
 0x129   : > { %2184 = vmatprep.subr.mxu1 %v2699_v5 }
 0x12a   : > { %2185 = vmatpush3.msra.mxu1 %v507_v49  ;;  %v790_v49 = vld [vmem:[#allocation7 + $0x268] sm:$0xff] }
 0x12b   : > { %2186 = vmatprep.subr.mxu1 %v2699_v5 }
 0x12c   : > { %2187 = vmatpush3.msra.mxu1 %v506_v50  ;;  %v789_v50 = vld [vmem:[#allocation7 + $0x260] sm:$0xff] }
 0x12d   : > { %2188 = vmatprep.subr.mxu1 %v2699_v5 }
 0x12e   : > { %2189 = vmatpush3.msra.mxu1 %v505_v51  ;;  %v788_v51 = vld [vmem:[#allocation7 + $0x258] sm:$0xff] }
 0x12f   : > { %2190 = vmatprep.subr.mxu1 %v2699_v5 }
 0x130   : > { %2191 = vmatpush3.msra.mxu1 %v504_v52  ;;  %v787_v52 = vld [vmem:[#allocation7 + $0x250] sm:$0xff] }
 0x131   : > { %2192 = vmatprep.subr.mxu1 %v2699_v5 }
 0x132   : > { %2193 = vmatpush3.msra.mxu1 %v503_v53  ;;  %v786_v53 = vld [vmem:[#allocation7 + $0x248] sm:$0xff] }
 0x133   : > { %2194 = vmatprep.subr.mxu1 %v2699_v5 }
 0x134   : > { %2195 = vmatpush3.msra.mxu1 %v502_v54  ;;  %v785_v54 = vld [vmem:[#allocation7 + $0x240] sm:$0xff] }
 0x135   : > { %2196 = vmatprep.subr.mxu1 %v2699_v5 }
 0x136   : > { %2197 = vmatpush3.msra.mxu1 %v501_v61  ;;  %v780_v61 = vld [vmem:[#allocation7 + $0x218] sm:$0xff] }
 0x137   : > { %2198 = vmatprep.subr.mxu1 %v2699_v5 }
 0x138   : > { %2199 = vmatpush3.msra.mxu1 %v500_v62  ;;  %v779_v62 = vld [vmem:[#allocation7 + $0x210] sm:$0xff] }
 0x139   : > { %2238 = vmatprep.subr.mxu1 %v2699_v5 }
 0x1d9   : > { %v401_v56 = vpop.f32.mrf.mxu1 }
 0x1da   : > { %v402_v57 = vadd.f32 %v1893_v55, %v401_v56  ;;  %v784_v55 = vld [vmem:[#allocation7 + $0x238] sm:$0xff]  ;;  %v783_v56 = vld [vmem:[#allocation7 + $0x230] sm:$0xff] }
 0x1db   : > { %v2132_v58 = vpop.f32.mrf.mxu1 }
 0x1dc   : > { %vm405_vm2 = vcmp.gt.f32.partialorder %v402_v57, 0.0  ;;  %v406_v59 = vmul.f32 0.1, %v402_v57 }
 0x1de   : > { %v407_v60 = vsel %vm405_vm2, %v402_v57, %v406_v59  ;;  %v782_v59 = vld [vmem:[#allocation7 + $0x228] sm:$0xff]  ;;  %vm1464_vm2 = vcmask 1046534  }
 0x1df   : > { %2166 = vmatmul.mubr.f32.vlgmr.msra.gmra.mxu0 %v407_v60  ;;  %v781_v60 = vld [vmem:[#allocation7 + $0x220] sm:$0xff] }
 0x1e0   : > { %2235 = vmatprep.mubr.msk.f32.mxu0 %vm2700_vm1, %v2699_v5  ;;  %2204 = vmatpush3.msra.mxu0 %v609_v63  ;;  %v888_v63 = vld [vmem:[#allocation7 + $0x308] sm:$0xff] }
 0x1e1   : > { %2205 = vmatprep.subr.mxu0 %v2699_v5 }
 0x1e2   : > { %2206 = vmatpush3.msra.mxu0 %v608_v0  ;;  %v887_v0 = vld [vmem:[#allocation7 + $0x300] sm:$0xff] }
 0x1e3   : > { %2207 = vmatprep.subr.mxu0 %v2699_v5 }
 0x1e4   : > { %2208 = vmatpush3.msra.mxu0 %v607_v1  ;;  %v886_v1 = vld [vmem:[#allocation7 + $0x2f8] sm:$0xff] }
 0x1e5   : > { %2209 = vmatprep.subr.mxu0 %v2699_v5 }
 0x1e6   : > { %2210 = vmatpush3.msra.mxu0 %v606_v2  ;;  %v885_v2 = vld [vmem:[#allocation7 + $0x2f0] sm:$0xff] }
 0x1e7   : > { %2211 = vmatprep.subr.mxu0 %v2699_v5 }
 0x1e8   : > { %2212 = vmatpush3.msra.mxu0 %v605_v3  ;;  %v884_v3 = vld [vmem:[#allocation7 + $0x2e8] sm:$0xff] }
 0x1e9   : > { %2213 = vmatprep.subr.mxu0 %v2699_v5 }
 0x1ea   : > { %2214 = vmatpush3.msra.mxu0 %v604_v4  ;;  %v883_v4 = vld [vmem:[#allocation7 + $0x2e0] sm:$0xff] }
 0x1eb   : > { %2215 = vmatprep.subr.mxu0 %v2699_v5 }
 0x1ec   : > { %2216 = vmatpush3.msra.mxu0 %v603_v6  ;;  %v882_v6 = vld [vmem:[#allocation7 + $0x2d8] sm:$0xff] }
 0x1ed   : > { %2217 = vmatprep.subr.mxu0 %v2699_v5 }
 0x1ee   : > { %2218 = vmatpush3.msra.mxu0 %v602_v7  ;;  %v881_v7 = vld [vmem:[#allocation7 + $0x2d0] sm:$0xff] }
 0x1ef   : > { %2219 = vmatprep.subr.mxu0 %v2699_v5 }
 0x1f0   : > { %2220 = vmatpush3.msra.mxu0 %v601_v8  ;;  %v880_v8 = vld [vmem:[#allocation7 + $0x2c8] sm:$0xff] }
 0x1f1   : > { %2221 = vmatprep.subr.mxu0 %v2699_v5 }
 0x1f2   : > { %2222 = vmatpush3.msra.mxu0 %v600_v9  ;;  %v879_v9 = vld [vmem:[#allocation7 + $0x2c0] sm:$0xff] }
 0x1f3   : > { %2223 = vmatprep.subr.mxu0 %v2699_v5 }
 0x1f4   : > { %2224 = vmatpush3.msra.mxu0 %v599_v10  ;;  %v878_v10 = vld [vmem:[#allocation7 + $0x2b8] sm:$0xff] }
 0x1f5   : > { %2225 = vmatprep.subr.mxu0 %v2699_v5 }
 0x1f6   : > { %2226 = vmatpush3.msra.mxu0 %v598_v11  ;;  %v877_v11 = vld [vmem:[#allocation7 + $0x2b0] sm:$0xff] }
 0x1f7   : > { %2227 = vmatprep.subr.mxu0 %v2699_v5 }
 0x1f8   : > { %2228 = vmatpush3.msra.mxu0 %v597_v12  ;;  %v876_v12 = vld [vmem:[#allocation7 + $0x2a8] sm:$0xff] }
 0x1f9   : > { %2229 = vmatprep.subr.mxu0 %v2699_v5 }
 0x1fa   : > { %2230 = vmatpush3.msra.mxu0 %v596_v35  ;;  %v966_v35 = vld [vmem:[#allocation7 + $0x3a0] sm:$0xff] }
 0x1fb   : > { %2231 = vmatprep.subr.mxu0 %v2699_v5 }
 0x1fc   : > { %2232 = vmatpush3.msra.mxu0 %v595_v36  ;;  %v965_v36 = vld [vmem:[#allocation7 + $0x398] sm:$0xff] }
 0x1fd   : > { %2233 = vmatprep.subr.mxu0 %v2699_v5 }
 0x1fe   : > { %2234 = vmatpush3.msra.mxu0 %v594_v38  ;;  %v964_v38 = vld [vmem:[#allocation7 + $0x390] sm:$0xff] }
 0x1ff   : > { %2273 = vmatprep.subr.mxu0 %v2699_v5 }
 0x29f   : > { %v495_v14 = vpop.f32.mrf.mxu0 }
 0x2a0   : > { %v496_v15 = vadd.f32 %v1894_v13, %v495_v14  ;;  %v1896_v13 = vld [vmem:[#allocation7 + $0x515] ss:$0 sm:$0xff] }
 0x2a1   : > { %v2167_v16 = vpop.f32.mrf.mxu0 }
 0x2a2   : > { %v2941_v17 = vadd.f32 %v496_v15, %v2901_v37  ;;  %v1897_v16 = vld [vmem:[#allocation7 + $0x518] ss:$0 sm:$0xff] }
 0x2a4   : > { %2201 = vmatmul.mubr.f32.vlgmr.msra.gmra.mxu1 %v2941_v17 }
 0x2a5   : > { %2239 = vmatpush3.msra.mxu1 %v700_v18  ;;  %2270 = vmatprep.mubr.msk.f32.mxu1 %vm2700_vm1, %v2699_v5 }
 0x2a6   : > { %2240 = vmatprep.subr.mxu1 %v2699_v5 }
 0x2a7   : > { %2241 = vmatpush3.msra.mxu1 %v699_v19 }
 0x2a8   : > { %2242 = vmatprep.subr.mxu1 %v2699_v5 }
 0x2a9   : > { %2243 = vmatpush3.msra.mxu1 %v698_v20 }
 0x2aa   : > { %2244 = vmatprep.subr.mxu1 %v2699_v5 }
 0x2ab   : > { %2245 = vmatpush3.msra.mxu1 %v697_v21 }
 0x2ac   : > { %2246 = vmatprep.subr.mxu1 %v2699_v5 }
 0x2ad   : > { %2247 = vmatpush3.msra.mxu1 %v696_v22  ;;  %v979_v22 = vld [vmem:[#allocation7 + $0x408] sm:$0xff] }
 0x2ae   : > { %2248 = vmatprep.subr.mxu1 %v2699_v5 }
 0x2af   : > { %2249 = vmatpush3.msra.mxu1 %v695_v23  ;;  %v978_v23 = vld [vmem:[#allocation7 + $0x400] sm:$0xff] }
 0x2b0   : > { %2250 = vmatprep.subr.mxu1 %v2699_v5 }
 0x2b1   : > { %2251 = vmatpush3.msra.mxu1 %v694_v24  ;;  %v977_v24 = vld [vmem:[#allocation7 + $0x3f8] sm:$0xff] }
 0x2b2   : > { %2252 = vmatprep.subr.mxu1 %v2699_v5 }
 0x2b3   : > { %2253 = vmatpush3.msra.mxu1 %v693_v25  ;;  %v976_v25 = vld [vmem:[#allocation7 + $0x3f0] sm:$0xff] }
 0x2b4   : > { %2254 = vmatprep.subr.mxu1 %v2699_v5 }
 0x2b5   : > { %2255 = vmatpush3.msra.mxu1 %v692_v26  ;;  %v974_v26 = vld [vmem:[#allocation7 + $0x3e0] sm:$0xff] }
 0x2b6   : > { %2256 = vmatprep.subr.mxu1 %v2699_v5 }
 0x2b7   : > { %2257 = vmatpush3.msra.mxu1 %v691_v27  ;;  %v973_v27 = vld [vmem:[#allocation7 + $0x3d8] sm:$0xff] }
 0x2b8   : > { %2258 = vmatprep.subr.mxu1 %v2699_v5 }
 0x2b9   : > { %2259 = vmatpush3.msra.mxu1 %v690_v28  ;;  %v972_v28 = vld [vmem:[#allocation7 + $0x3d0] sm:$0xff] }
 0x2ba   : > { %2260 = vmatprep.subr.mxu1 %v2699_v5 }
 0x2bb   : > { %2261 = vmatpush3.msra.mxu1 %v689_v29  ;;  %v971_v29 = vld [vmem:[#allocation7 + $0x3c8] sm:$0xff] }
 0x2bc   : > { %2262 = vmatprep.subr.mxu1 %v2699_v5 }
 0x2bd   : > { %2263 = vmatpush3.msra.mxu1 %v688_v30  ;;  %v970_v30 = vld [vmem:[#allocation7 + $0x3c0] sm:$0xff] }
 0x2be   : > { %2264 = vmatprep.subr.mxu1 %v2699_v5 }
 0x2bf   : > { %2265 = vmatpush3.msra.mxu1 %v687_v31  ;;  %v969_v31 = vld [vmem:[#allocation7 + $0x3b8] sm:$0xff] }
 0x2c0   : > { %2266 = vmatprep.subr.mxu1 %v2699_v5 }
 0x2c1   : > { %2267 = vmatpush3.msra.mxu1 %v686_v32  ;;  %v968_v32 = vld [vmem:[#allocation7 + $0x3b0] sm:$0xff] }
 0x2c2   : > { %2268 = vmatprep.subr.mxu1 %v2699_v5 }
 0x2c3   : > { %2269 = vmatpush3.msra.mxu1 %v685_v33  ;;  %v967_v33 = vld [vmem:[#allocation7 + $0x3a8] sm:$0xff] }
 0x2c4   : > { %2271 = vmatmul.mubr.f32.vlgmr.msra.gmra.mxu1 %v2901_v37  ;;  %2308 = vmatprep.subr.mxu1 %v2699_v5 }
 0x2c5   : > { %2340 = vmatprep.mubr.msk.f32.mxu1 %vm2700_vm1, %v2699_v5  ;;  %2309 = vmatpush3.msra.mxu1 %v888_v63  ;;  %v1073_v63 = vld [vmem:[#allocation7 + $0x488] sm:$0xff] }
 0x2c6   : > { %2310 = vmatprep.subr.mxu1 %v2699_v5 }
 0x2c7   : > { %2311 = vmatpush3.msra.mxu1 %v887_v0 }
 0x2c8   : > { %2312 = vmatprep.subr.mxu1 %v2699_v5 }
 0x2c9   : > { %2313 = vmatpush3.msra.mxu1 %v886_v1  ;;  %v1072_v1 = vld [vmem:[#allocation7 + $0x480] sm:$0xff] }
 0x2ca   : > { %2314 = vmatprep.subr.mxu1 %v2699_v5 }
 0x2cb   : > { %2315 = vmatpush3.msra.mxu1 %v885_v2  ;;  %v1071_v2 = vld [vmem:[#allocation7 + $0x478] sm:$0xff] }
 0x2cc   : > { %2316 = vmatprep.subr.mxu1 %v2699_v5 }
 0x2cd   : > { %2317 = vmatpush3.msra.mxu1 %v884_v3  ;;  %v1070_v3 = vld [vmem:[#allocation7 + $0x470] sm:$0xff] }
 0x2ce   : > { %2318 = vmatprep.subr.mxu1 %v2699_v5 }
 0x2cf   : > { %2319 = vmatpush3.msra.mxu1 %v883_v4  ;;  %v1069_v4 = vld [vmem:[#allocation7 + $0x468] sm:$0xff] }
 0x2d0   : > { %2320 = vmatprep.subr.mxu1 %v2699_v5 }
 0x2d1   : > { %2321 = vmatpush3.msra.mxu1 %v882_v6  ;;  %v1068_v6 = vld [vmem:[#allocation7 + $0x460] sm:$0xff] }
 0x2d2   : > { %2322 = vmatprep.subr.mxu1 %v2699_v5 }
 0x2d3   : > { %2323 = vmatpush3.msra.mxu1 %v881_v7  ;;  %v1067_v7 = vld [vmem:[#allocation7 + $0x458] sm:$0xff] }
 0x2d4   : > { %2324 = vmatprep.subr.mxu1 %v2699_v5 }
 0x2d5   : > { %2325 = vmatpush3.msra.mxu1 %v880_v8  ;;  %v1066_v8 = vld [vmem:[#allocation7 + $0x450] sm:$0xff] }
 0x2d6   : > { %2326 = vmatprep.subr.mxu1 %v2699_v5 }
 0x2d7   : > { %2327 = vmatpush3.msra.mxu1 %v879_v9  ;;  %v1065_v9 = vld [vmem:[#allocation7 + $0x448] sm:$0xff] }
 0x2d8   : > { %2328 = vmatprep.subr.mxu1 %v2699_v5 }
 0x2d9   : > { %2329 = vmatpush3.msra.mxu1 %v878_v10  ;;  %v1064_v10 = vld [vmem:[#allocation7 + $0x440] sm:$0xff] }
 0x2da   : > { %2330 = vmatprep.subr.mxu1 %v2699_v5 }
 0x2db   : > { %2331 = vmatpush3.msra.mxu1 %v877_v11  ;;  %v1063_v11 = vld [vmem:[#allocation7 + $0x438] sm:$0xff] }
 0x2dc   : > { %2332 = vmatprep.subr.mxu1 %v2699_v5 }
 0x2dd   : > { %2333 = vmatpush3.msra.mxu1 %v876_v12 }
 0x2de   : > { %2334 = vmatprep.subr.mxu1 %v2699_v5 }
 0x364   : > { %v587_v40 = vpop.f32.mrf.mxu1 }
 0x365   : > { %v588_v41 = vadd.f32 %v1895_v39, %v587_v40  ;;  %v1164_v39 = vld [vmem:[#allocation7 + $0x508] sm:$0xff]  ;;  %v1163_v40 = vld [vmem:[#allocation7 + $0x500] sm:$0xff] }
 0x366   : > { %v2202_v42 = vpop.f32.mrf.mxu1 }
 0x367   : > { %vm591_vm3 = vcmp.gt.f32.partialorder %v588_v41, 0.0  ;;  %v592_v43 = vmul.f32 0.1, %v588_v41  ;;  %v1161_v42 = vld [vmem:[#allocation7 + $0x4f0] sm:$0xff] }
 0x369   : > { %v593_v45 = vsel %vm591_vm3, %v588_v41, %v592_v43  ;;  %v1162_v41 = vld [vmem:[#allocation7 + $0x4f8] sm:$0xff]  ;;  %v1160_v43 = vld [vmem:[#allocation7 + $0x4e8] sm:$0xff]  ;;  %vm1466_vm3 = vcmask 1047559  }
 0x36a   : > { %2236 = vmatmul.mubr.f32.vlgmr.msra.gmra.mxu0 %v593_v45  ;;  %v1157_v45 = vld [vmem:[#allocation7 + $0x4d0] sm:$0xff] }
 0x36b   : > { %2274 = vmatpush3.msra.mxu0 %v794_v44  ;;  %2305 = vmatprep.mubr.msk.f32.mxu0 %vm2700_vm1, %v2699_v5  ;;  %v1158_v44 = vld [vmem:[#allocation7 + $0x4d8] sm:$0xff] }
 0x36c   : > { %2275 = vmatprep.subr.mxu0 %v2699_v5 }
 0x36d   : > { %2276 = vmatpush3.msra.mxu0 %v793_v46  ;;  %v1156_v46 = vld [vmem:[#allocation7 + $0x4c8] sm:$0xff] }
 0x36e   : > { %2277 = vmatprep.subr.mxu0 %v2699_v5 }
 0x36f   : > { %2278 = vmatpush3.msra.mxu0 %v792_v47  ;;  %v1155_v47 = vld [vmem:[#allocation7 + $0x4c0] sm:$0xff] }
 0x370   : > { %2279 = vmatprep.subr.mxu0 %v2699_v5 }
 0x371   : > { %2280 = vmatpush3.msra.mxu0 %v791_v48  ;;  %v1154_v48 = vld [vmem:[#allocation7 + $0x4b8] sm:$0xff] }
 0x372   : > { %2281 = vmatprep.subr.mxu0 %v2699_v5 }
 0x373   : > { %2282 = vmatpush3.msra.mxu0 %v790_v49  ;;  %v1153_v49 = vld [vmem:[#allocation7 + $0x4b0] sm:$0xff] }
 0x374   : > { %2283 = vmatprep.subr.mxu0 %v2699_v5 }
 0x375   : > { %2284 = vmatpush3.msra.mxu0 %v789_v50  ;;  %v1152_v50 = vld [vmem:[#allocation7 + $0x4a8] sm:$0xff] }
 0x376   : > { %2285 = vmatprep.subr.mxu0 %v2699_v5 }
 0x377   : > { %2286 = vmatpush3.msra.mxu0 %v788_v51  ;;  %v1151_v51 = vld [vmem:[#allocation7 + $0x4a0] sm:$0xff] }
 0x378   : > { %2287 = vmatprep.subr.mxu0 %v2699_v5 }
 0x379   : > { %2288 = vmatpush3.msra.mxu0 %v787_v52  ;;  %v1150_v52 = vld [vmem:[#allocation7 + $0x498] sm:$0xff] }
 0x37a   : > { %2289 = vmatprep.subr.mxu0 %v2699_v5 }
 0x37b   : > { %2290 = vmatpush3.msra.mxu0 %v786_v53  ;;  %v1892_v53 = vld [vmem:[#allocation7 + $0x511] ss:$0 sm:$0xff] }
 0x37c   : > { %2291 = vmatprep.subr.mxu0 %v2699_v5 }
 0x37d   : > { %2292 = vmatpush3.msra.mxu0 %v785_v54  ;;  %v1149_v54 = vld [vmem:[#allocation7 + $0x490] sm:$0xff] }
 0x37e   : > { %2293 = vmatprep.subr.mxu0 %v2699_v5 }
 0x37f   : > { %2294 = vmatpush3.msra.mxu0 %v784_v55  ;;  %v313_v55 = vadd.f32 %v2899_v34, %v1892_v53 }
 0x380   : > { %2295 = vmatprep.subr.mxu0 %v2699_v5 }
 0x381   : > { %2296 = vmatpush3.msra.mxu0 %v783_v56  ;;  %v875_v56 = vld [vmem:[#allocation7 + $0x2a0] sm:$0xff] }
 0x382   : > { %2297 = vmatprep.subr.mxu0 %v2699_v5  ;;  %2335 = vmatpush3.msra.mxu1 %v875_v56 }
 0x383   : > { %2298 = vmatpush3.msra.mxu0 %v782_v59  ;;  %2336 = vmatprep.subr.mxu1 %v2699_v5  ;;  %v1898_v59 = vld [vmem:[#allocation7 + $0x516] ss:$0 sm:$0xff] }
 0x384   : > { %v767_v57 = vpop.f32.mrf.mxu1  ;;  %2299 = vmatprep.subr.mxu0 %v2699_v5 }
 0x385   : > { %2300 = vmatpush3.msra.mxu0 %v781_v60 }
 0x386   : > { %v2272_v58 = vpop.f32.mrf.mxu1  ;;  %2301 = vmatprep.subr.mxu0 %v2699_v5 }
 0x387   : > { %2302 = vmatpush3.msra.mxu0 %v780_v61  ;;  %v873_v58 = vld [vmem:[#allocation7 + $0x290] sm:$0xff] }
 0x388   : > { %2303 = vmatprep.subr.mxu0 %v2699_v5 }
 0x389   : > { %2304 = vmatpush3.msra.mxu0 %v779_v62 }
 0x38a   : > { %2343 = vmatprep.subr.mxu0 %v2699_v5 }
 0x42a   : > { %v681_v14 = vpop.f32.mrf.mxu0 }
 0x42b   : > { %v682_v15 = vadd.f32 %v1896_v13, %v681_v14 }
 0x42c   : > { %v2237_v18 = vpop.f32.mrf.mxu0 }
 0x42d   : > { %v771_v19 = vadd.f32 %v767_v57, %v682_v15  ;;  %v874_v57 = vld [vmem:[#allocation7 + $0x298] sm:$0xff]  ;;  %v1061_v18 = vld [vmem:[#allocation7 + $0x428] sm:$0xff] }
 0x42e   : > { %2337 = vmatpush3.msra.mxu1 %v874_v57 }
 0x42f   : > { %v777_v20 = vadd.f32 %v1897_v16, %v771_v19  ;;  %2338 = vmatprep.subr.mxu1 %v2699_v5  ;;  %v1062_v16 = vld [vmem:[#allocation7 + $0x430] sm:$0xff]  ;;  %v1060_v19 = vld [vmem:[#allocation7 + $0x420] sm:$0xff] }
 0x430   : > { %2339 = vmatpush3.msra.mxu1 %v873_v58 }
 0x431   : > { %v3000_v21 = vadd.f32 %v777_v20, %v2941_v17  ;;  %v975_v17 = vld [vmem:[#allocation7 + $0x3e8] sm:$0xff]  ;;  %2378 = vmatprep.subr.mxu1 %v2699_v5  ;;  %v1059_v20 = vld [vmem:[#allocation7 + $0x418] sm:$0xff] }
 0x433   : > { %2306 = vmatmul.mubr.f32.vlgmr.msra.gmra.mxu0 %v3000_v21 }
 0x434   : > { %2344 = vmatpush3.msra.mxu0 %v979_v22  ;;  %2375 = vmatprep.mubr.msk.f32.mxu0 %vm2700_vm1, %v2699_v5  ;;  %v1058_v22 = vld [vmem:[#allocation7 + $0x410] sm:$0xff] }
 0x435   : > { %2345 = vmatprep.subr.mxu0 %v2699_v5 }
 0x436   : > { %2346 = vmatpush3.msra.mxu0 %v978_v23  ;;  %v1899_v23 = vld [vmem:[#allocation7 + $0x517] ss:$0 sm:$0xff] }
 0x437   : > { %2347 = vmatprep.subr.mxu0 %v2699_v5 }
 0x438   : > { %2348 = vmatpush3.msra.mxu0 %v977_v24 }
 0x439   : > { %2349 = vmatprep.subr.mxu0 %v2699_v5 }
 0x43a   : > { %2350 = vmatpush3.msra.mxu0 %v976_v25 }
 0x43b   : > { %2351 = vmatprep.subr.mxu0 %v2699_v5 }
 0x43c   : > { %2352 = vmatpush3.msra.mxu0 %v975_v17  ;;  %v1900_v17 = vld [vmem:[#allocation7 + $0x519] ss:$0 sm:$0xff] }
 0x43d   : > { %2353 = vmatprep.subr.mxu0 %v2699_v5 }
 0x43e   : > { %2354 = vmatpush3.msra.mxu0 %v974_v26 }
 0x43f   : > { %2355 = vmatprep.subr.mxu0 %v2699_v5 }
 0x440   : > { %2356 = vmatpush3.msra.mxu0 %v973_v27 }
 0x441   : > { %2357 = vmatprep.subr.mxu0 %v2699_v5 }
 0x442   : > { %2358 = vmatpush3.msra.mxu0 %v972_v28 }
 0x443   : > { %2359 = vmatprep.subr.mxu0 %v2699_v5 }
 0x444   : > { %2360 = vmatpush3.msra.mxu0 %v971_v29 }
 0x445   : > { %2361 = vmatprep.subr.mxu0 %v2699_v5 }
 0x446   : > { %2362 = vmatpush3.msra.mxu0 %v970_v30  ;;  %v2701_v30 = vmov 1966171168  }
 0x447   : > { %2363 = vmatprep.subr.mxu0 %v2699_v5 }
 0x448   : > { %2364 = vmatpush3.msra.mxu0 %v969_v31  ;;  %v1238_v31 = vunpack.c.l.s4 %v2701_v30 }
 0x449   : > { %2365 = vmatprep.subr.mxu0 %v2699_v5 }
 0x44a   : > { %2366 = vmatpush3.msra.mxu0 %v968_v32  ;;  %v1240_v32 = vlaneseq }
 0x44b   : > { %2367 = vmatprep.subr.mxu0 %v2699_v5 }
 0x44c   : > { %2368 = vmatpush3.msra.mxu0 %v967_v33  ;;  %v1239_v33 = vunpack.c.0.s8 %v1238_v31 }
 0x44d   : > { %2369 = vmatprep.subr.mxu0 %v2699_v5 }
 0x44e   : > { %2370 = vmatpush3.msra.mxu0 %v966_v35  ;;  %v3064_v35 = vshrl.u32 %v1240_v32, 7 }
 0x44f   : > { %2371 = vmatprep.subr.mxu0 %v2699_v5 }
 0x450   : > { %2372 = vmatpush3.msra.mxu0 %v965_v36  ;;  %v1901_v36 = vld [vmem:[#allocation7 + $0x51a] ss:$0 sm:$0xff] }
 0x451   : > { %2373 = vmatprep.subr.mxu0 %v2699_v5 }
 0x452   : > { %2374 = vmatpush3.msra.mxu0 %v964_v38 }
 0x453   : > { %2376 = vmatmul.mubr.f32.vlgmr.msra.gmra.mxu0 %v2901_v37  ;;  %2413 = vmatprep.subr.mxu0 %v2699_v5  ;;  %v1159_v37 = vld [vmem:[#allocation7 + $0x4e0] sm:$0xff] }
 0x454   : > { %2414 = vmatpush3.msra.mxu0 %v1164_v39  ;;  %2445 = vmatprep.mubr.msk.f32.mxu0 %vm2700_vm1, %v2699_v5 }
 0x455   : > { %2415 = vmatprep.subr.mxu0 %v2699_v5 }
 0x456   : > { %2416 = vmatpush3.msra.mxu0 %v1163_v40 }
 0x457   : > { %2417 = vmatprep.subr.mxu0 %v2699_v5 }
 0x458   : > { %2418 = vmatpush3.msra.mxu0 %v1162_v41 }
 0x459   : > { %2419 = vmatprep.subr.mxu0 %v2699_v5 }
 0x45a   : > { %2420 = vmatpush3.msra.mxu0 %v1161_v42 }
 0x45b   : > { %2421 = vmatprep.subr.mxu0 %v2699_v5 }
 0x45c   : > { %2422 = vmatpush3.msra.mxu0 %v1160_v43  ;;  %v3068_v43 = vsub.s32 0, %v3064_v35 }
 0x45d   : > { %2423 = vmatprep.subr.mxu0 %v2699_v5 }
 0x45e   : > { %2424 = vmatpush3.msra.mxu0 %v1159_v37 }
 0x45f   : > { %2425 = vmatprep.subr.mxu0 %v2699_v5 }
 0x460   : > { %2426 = vmatpush3.msra.mxu0 %v1158_v44 }
 0x461   : > { %2427 = vmatprep.subr.mxu0 %v2699_v5 }
 0x462   : > { %2428 = vmatpush3.msra.mxu0 %v1157_v45 }
 0x463   : > { %2429 = vmatprep.subr.mxu0 %v2699_v5 }
 0x464   : > { %2430 = vmatpush3.msra.mxu0 %v1156_v46 }
 0x465   : > { %2431 = vmatprep.subr.mxu0 %v2699_v5 }
 0x466   : > { %2432 = vmatpush3.msra.mxu0 %v1155_v47 }
 0x467   : > { %2433 = vmatprep.subr.mxu0 %v2699_v5 }
 0x468   : > { %2434 = vmatpush3.msra.mxu0 %v1154_v48 }
 0x469   : > { %2435 = vmatprep.subr.mxu0 %v2699_v5 }
 0x46a   : > { %2436 = vmatpush3.msra.mxu0 %v1153_v49 }
 0x46b   : > { %2437 = vmatprep.subr.mxu0 %v2699_v5 }
 0x46c   : > { %2438 = vmatpush3.msra.mxu0 %v1152_v50 }
 0x46d   : > { %2439 = vmatprep.subr.mxu0 %v2699_v5 }
 0x46e   : > { %2440 = vmatpush3.msra.mxu0 %v1151_v51 }
 0x46f   : > { %2441 = vmatprep.subr.mxu0 %v2699_v5 }
 0x470   : > { %2442 = vmatpush3.msra.mxu0 %v1150_v52 }
 0x471   : > { %2443 = vmatprep.subr.mxu0 %v2699_v5 }
 0x472   : > { %2444 = vmatpush3.msra.mxu0 %v1149_v54 }
 0x473   : > { %2446 = vmatmul.mubr.f32.vlgmr.msra.gmra.mxu0 %v313_v55 }
 0x4f3   : > { %v866_v60 = vpop.f32.mrf.mxu0 }
 0x4f4   : > { %v867_v61 = vadd.f32 %v1898_v59, %v866_v60 }
 0x4f5   : > { %v2307_v34 = vpop.f32.mrf.mxu0 }
 0x4f6   : > { %vm870_vm4 = vcmp.gt.f32.partialorder %v867_v61, 0.0  ;;  %v871_v62 = vmul.f32 0.1, %v867_v61 }
 0x4f8   : > { %v872_v0 = vsel %vm870_vm4, %v867_v61, %v871_v62  ;;  %v1902_v61 = vld [vmem:[#allocation7 + $0x51b] ss:$0 sm:$0xff]  ;;  %vm1469_vm4 = vcmask 64512  }
 0x4f9   : > { %2341 = vmatmul.mubr.f32.vlgmr.msra.gmra.mxu1 %v872_v0 }
 0x4fa   : > { %2379 = vmatpush3.msra.mxu1 %v1073_v63  ;;  %2410 = vmatprep.mubr.msk.f32.mxu1 %vm2700_vm1, %v2699_v5  ;;  %vm1462_vm1 = vcmask 1045509  }
 0x4fb   : > { %2380 = vmatprep.subr.mxu1 %v2699_v5 }
 0x4fc   : > { %2381 = vmatpush3.msra.mxu1 %v1072_v1 }
 0x4fd   : > { %2382 = vmatprep.subr.mxu1 %v2699_v5 }
 0x4fe   : > { %2383 = vmatpush3.msra.mxu1 %v1071_v2 }
 0x4ff   : > { %2384 = vmatprep.subr.mxu1 %v2699_v5 }
 0x500   : > { %2385 = vmatpush3.msra.mxu1 %v1070_v3 }
 0x501   : > { %2386 = vmatprep.subr.mxu1 %v2699_v5 }
 0x502   : > { %2387 = vmatpush3.msra.mxu1 %v1069_v4 }
 0x503   : > { %2388 = vmatprep.subr.mxu1 %v2699_v5 }
 0x504   : > { %2389 = vmatpush3.msra.mxu1 %v1068_v6 }
 0x505   : > { %2390 = vmatprep.subr.mxu1 %v2699_v5 }
 0x506   : > { %2391 = vmatpush3.msra.mxu1 %v1067_v7 }
 0x507   : > { %2392 = vmatprep.subr.mxu1 %v2699_v5 }
 0x508   : > { %2393 = vmatpush3.msra.mxu1 %v1066_v8 }
 0x509   : > { %2394 = vmatprep.subr.mxu1 %v2699_v5 }
 0x50a   : > { %2395 = vmatpush3.msra.mxu1 %v1065_v9 }
 0x50b   : > { %2396 = vmatprep.subr.mxu1 %v2699_v5 }
 0x50c   : > { %2397 = vmatpush3.msra.mxu1 %v1064_v10 }
 0x50d   : > { %2398 = vmatprep.subr.mxu1 %v2699_v5 }
 0x50e   : > { %2399 = vmatpush3.msra.mxu1 %v1063_v11 }
 0x50f   : > { %2400 = vmatprep.subr.mxu1 %v2699_v5 }
 0x510   : > { %2401 = vmatpush3.msra.mxu1 %v1062_v16 }
 0x511   : > { %2402 = vmatprep.subr.mxu1 %v2699_v5 }
 0x512   : > { %2403 = vmatpush3.msra.mxu1 %v1061_v18 }
 0x513   : > { %v1046_v12 = vpop.f32.mrf.mxu0  ;;  %2404 = vmatprep.subr.mxu1 %v2699_v5 }
 0x514   : > { %2405 = vmatpush3.msra.mxu1 %v1060_v19 }
 0x515   : > { %v2377_v13 = vpop.f32.mrf.mxu0  ;;  %2406 = vmatprep.subr.mxu1 %v2699_v5 }
 0x516   : > { %2407 = vmatpush3.msra.mxu1 %v1059_v20 }
 0x517   : > { %2408 = vmatprep.subr.mxu1 %v2699_v5  ;;  %v1242_v5 = vsub.s32 %v1239_v33, %v3064_v35 }
 0x518   : > { %2409 = vmatpush3.msra.mxu1 %v1058_v22 }
 0x533   : > { %v3056_v14 = vpop.f32.mrf.mxu0 }
 0x535   : > { %v2447_v15 = vpop.f32.mrf.mxu0 }
 0x5b9   : > { %v960_v24 = vpop.f32.mrf.mxu1 }
 0x5ba   : > { %v961_v25 = vadd.f32 %v1899_v23, %v960_v24 }
 0x5bb   : > { %v2342_v26 = vpop.f32.mrf.mxu1 }
 0x5bc   : > { %v1050_v27 = vadd.f32 %v1046_v12, %v961_v25 }
 0x5be   : > { %v1056_v28 = vadd.f32 %v1900_v17, %v1050_v27 }
 0x5c0   : > { %v1057_v29 = vadd.f32 %v1056_v28, %v3000_v21 }
 0x5c2   : > { %2411 = vmatmul.mubr.f32.vlgmr.msra.gmra.mxu1 %v1057_v29 }
 0x682   : > { %v1145_v38 = vpop.f32.mrf.mxu1 }
 0x683   : > { %v1146_v39 = vadd.f32 %v1901_v36, %v1145_v38  ;;  %v1421_v36 = vand.u32 127, %v1240_v32 }
 0x684   : > { %v2412_v40 = vpop.f32.mrf.mxu1 }
 0x685   : > { %v1236_v41 = vcombine.high %v1146_v39, %v1146_v39  ;;  %v1243_v42 = vrot.slane %v1146_v39, %v1242_v5 }
 0x687   : > { %v1250_v21 = vrot.slane %v1236_v41, %v1242_v5  ;;  %v1251_v37 = vcombine.high %v1243_v42, %v1243_v42  ;;  %v1259_v44 = vrot.slane %v1243_v42, %v1242_v5  ;;  %v3092_v41 = vsub.s32 %v1421_v36, %v3064_v35 }
 0x689   : > { %v1252_v45 = vcombine.high %v1250_v21, %v1250_v21  ;;  %v1266_v46 = vrot.slane %v1250_v21, %v1242_v5  ;;  %v1273_v47 = vrot.slane %v1251_v37, %v1242_v5  ;;  %v1281_v48 = vcombine.high %v1259_v44, %v1259_v44 }
 0x68a   : > { %v1288_v49 = vrot.slane %v1259_v44, %v3068_v43 }
 0x68b   : > { %v1280_v50 = vrot.slane %v1252_v45, %v1242_v5  ;;  %v1283_v51 = vcombine.high %v1273_v47, %v1273_v47  ;;  %v1292_v52 = vrot.slane %v1273_v47, %v3068_v43  ;;  %v1304_v53 = vrot.slane %v1266_v46, %v3068_v43 }
 0x68c   : > { %v1325_v54 = vadd.f32 %v1288_v49, %v3056_v14  ;;  %v1296_v55 = vrot.slane %v1281_v48, %v3068_v43  ;;  %v1282_v56 = vcombine.high %v1266_v46, %v1266_v46 }
 0x68d   : > { %v1326_v57 = vadd.f32 %v1292_v52, %v3056_v14  ;;  %v1300_v58 = vrot.slane %v1283_v51, %v3068_v43  ;;  %v1308_v59 = vrot.slane %v1280_v50, %v3068_v43  ;;  %v1329_v62 = vadd.f32 %v1304_v53, %v3056_v14 }
 0x68e   : > { %vm1333_vm5 = vcmp.gt.f32.partialorder %v1325_v54, 0.0  ;;  %v1341_v60 = vmul.f32 0.1, %v1325_v54  ;;  %v1327_v34 = vadd.f32 %v1296_v55, %v3056_v14  ;;  %v1284_v63 = vcombine.high %v1280_v50, %v1280_v50 }
 0x68f   : > { %vm1334_vm6 = vcmp.gt.f32.partialorder %v1326_v57, 0.0  ;;  %v1342_v0 = vmul.f32 0.1, %v1326_v57  ;;  %v1328_v1 = vadd.f32 %v1300_v58, %v3056_v14  ;;  %v1330_v4 = vadd.f32 %v1308_v59, %v3056_v14 }
 0x690   : > { %v1349_v2 = vsel %vm1333_vm5, %v1325_v54, %v1341_v60  ;;  %vm1335_vm7 = vcmp.gt.f32.partialorder %v1327_v34, 0.0  ;;  %v1343_v3 = vmul.f32 0.1, %v1327_v34  ;;  %v1345_v10 = vmul.f32 0.1, %v1329_v62 }
 0x691   : > { %v1362_v6 = vmul.f32 %v1902_v61, %v1349_v2  ;;  %vm1336_vm8 = vcmp.gt.f32.partialorder %v1328_v1, 0.0  ;;  %v1344_v7 = vmul.f32 0.1, %v1328_v1  ;;  %v1350_v9 = vsel %vm1334_vm6, %v1326_v57, %v1342_v0 }
 0x692   : > { %v1351_v8 = vsel %vm1335_vm7, %v1327_v34, %v1343_v3  ;;  %vm1337_vm9 = vcmp.gt.f32.partialorder %v1329_v62, 0.0  ;;  %v1312_v12 = vrot.slane %v1282_v56, %v3068_v43  ;;  %v1346_v15 = vmul.f32 0.1, %v1330_v4 }
 0x693   : > { %1370 = vadd.xlane.f32.xlu0 %v1362_v6  ;;  %v1364_v11 = vmul.f32 %v1902_v61, %v1351_v8  ;;  %v1352_v13 = vsel %vm1336_vm8, %v1328_v1, %v1344_v7  ;;  %v1316_v16 = vrot.slane %v1284_v63, %v3068_v43  ;;  %v1363_v18 = vmul.f32 %v1902_v61, %v1350_v9 }
 0x694   : > { %vm1338_vm10 = vcmp.gt.f32.partialorder %v1330_v4, 0.0  ;;  %v1331_v19 = vadd.f32 %v1312_v12, %v3056_v14  ;;  %v1353_v20 = vsel %vm1337_vm9, %v1329_v62, %v1345_v10  ;;  %v1365_v23 = vmul.f32 %v1902_v61, %v1352_v13 }
 0x695   : > { %1374 = vadd.xlane.f32.xlu1 %v1364_v11  ;;  %v1332_v22 = vadd.f32 %v1316_v16, %v3056_v14  ;;  %v1354_v25 = vsel %vm1338_vm10, %v1330_v4, %v1346_v15  ;;  %v1366_v26 = vmul.f32 %v1902_v61, %v1353_v20  ;;  %v1387_v14 = vstv %s1903_s22 }
 0x696   : > { %vm1339_vm11 = vcmp.gt.f32.partialorder %v1331_v19, 0.0  ;;  %v1347_v24 = vmul.f32 0.1, %v1331_v19  ;;  %v1367_v28 = vmul.f32 %v1902_v61, %v1354_v25  ;;  %v2702_v11 = vmov 0  }
 0x697   : > { %1372 = vadd.xlane.f32.xlu0 %v1363_v18  ;;  %v1348_v17 = vmul.f32 0.1, %v1332_v22  ;;  %vm1340_vm12 = vcmp.gt.f32.partialorder %v1332_v22, 0.0  ;;  %2521 = vset.pattern.permute.xlu1 %v2702_v11  ;;  %v1480_v12 = vsub.s32 1, %v3064_v35  ;;  %v1484_v13 = vsub.s32 2, %v3064_v35 }
 0x698   : > { %v1355_v27 = vsel %vm1339_vm11, %v1331_v19, %v1347_v24  ;;  %2522 = vset.pattern.permute.xlu0 %v2702_v11  ;;  %v1488_v15 = vsub.s32 3, %v3064_v35  ;;  %v1492_v16 = vsub.s32 4, %v3064_v35  ;;  %v1523_v24 = vstv %s1522_s25 }
 0x699   : > { %1376 = vadd.xlane.f32.xlu1 %v1365_v23  ;;  %v1356_v29 = vsel %vm1340_vm12, %v1332_v22, %v1348_v17  ;;  %v1368_v30 = vmul.f32 %v1902_v61, %v1355_v27  ;;  %v1496_v27 = vsub.s32 5, %v3064_v35 }
 0x69a   : > { %v1369_v31 = vmul.f32 %v1902_v61, %v1356_v29 }
 0x69b   : > { %1378 = vadd.xlane.f32.xlu0 %v1366_v26 }
 0x69d   : > { %1380 = vadd.xlane.f32.xlu1 %v1367_v28 }
 0x69f   : > { %1382 = vadd.xlane.f32.xlu0 %v1368_v30 }
 0x6a1   : > { %1384 = vadd.xlane.f32.xlu1 %v1369_v31 }
 0x71c   : > { %v1371_v33 = vpop.xlane.xlu0 %1370 }
 0x71d   : > { %v3087_v5 = vadd.f32 %v1387_v14, %v1371_v33 }
 0x71e   : > { %v1375_v38 = vpop.xlane.xlu1 %1374 }
 0x71f   : > { %v3089_v39 = vadd.f32 %v1387_v14, %v1375_v38  ;;  %v1904_v42 = vclamps-f32 %v3087_v5, 10.0  ;;  %v1500_v5 = vsub.s32 6, %v3064_v35 }
 0x720   : > { %v1373_v40 = vpop.xlane.xlu0 %1372 }
 0x721   : > { %v1389_v21 = vadd.f32 %v1387_v14, %v1373_v40  ;;  %v1906_v37 = vclamps-f32 %v3089_v39, 10.0  ;;  %v1425_v47 = vrot.slane %v1904_v42, %v3092_v41 }
 0x722   : > { %v1377_v44 = vpop.xlane.xlu1 %1376 }
 0x723   : > { %v1905_v45 = vclamps-f32 %v1389_v21, 10.0  ;;  %v1391_v46 = vadd.f32 %v1387_v14, %v1377_v44  ;;  %v1433_v51 = vrot.slane %v1906_v37, %v3092_v41  ;;  %v1504_v21 = vsub.s32 7, %v3064_v35 }
 0x724   : > { %v1379_v32 = vpop.xlane.xlu0 %1378 }
 0x725   : > { %v1429_v48 = vrot.slane %v1905_v45, %v3092_v41  ;;  %v1907_v49 = vclamps-f32 %v1391_v46, 10.0  ;;  %v1392_v50 = vadd.f32 %v1387_v14, %v1379_v32 }
 0x726   : > { %v1381_v52 = vpop.xlane.xlu1 %1380 }
 0x727   : > { %v1455_v53 = vsel %vm1454_vm13, %v1429_v48, %v1425_v47  ;;  %v1437_v54 = vrot.slane %v1907_v49, %v3092_v41  ;;  %v1908_v55 = vclamps-f32 %v1392_v50, 10.0  ;;  %v1393_v56 = vadd.f32 %v1387_v14, %v1381_v52 }
 0x728   : > { %v1457_v57 = vsel %vm1456_vm14, %v1433_v51, %v1455_v53  ;;  %v1383_v58 = vpop.xlane.xlu0 %1382 }
 0x729   : > { %v1459_v59 = vsel %vm1458_vm15, %v1437_v54, %v1457_v57  ;;  %v1441_v60 = vrot.slane %v1908_v55, %v3092_v41  ;;  %v1909_v61 = vclamps-f32 %v1393_v56, 10.0  ;;  %v1394_v34 = vadd.f32 %v1387_v14, %v1383_v58 }
 0x72a   : > { %v1385_v62 = vpop.xlane.xlu1 %1384 }
 0x72b   : > { %v1461_v63 = vsel %vm1460_vm0, %v1441_v60, %v1459_v59  ;;  %v1445_v0 = vrot.slane %v1909_v61, %v3092_v41  ;;  %v1910_v1 = vclamps-f32 %v1394_v34, 10.0  ;;  %v1395_v2 = vadd.f32 %v1387_v14, %v1385_v62 }
 0x72d   : > { %v1449_v3 = vrot.slane %v1910_v1, %v3092_v41  ;;  %v1911_v4 = vclamps-f32 %v1395_v2, 10.0  ;;  %v1463_v6 = vsel %vm1462_vm1, %v1445_v0, %v1461_v63 }
 0x72f   : > { %v1453_v7 = vrot.slane %v1911_v4, %v3092_v41  ;;  %v1465_v8 = vsel %vm1464_vm2, %v1449_v3, %v1463_v6 }
 0x731   : > { %v1467_v9 = vsel %vm1466_vm3, %v1453_v7, %v1465_v8 }
 0x732   : > { %v1470_v10 = vsel %vm1469_vm4, %v1467_v9, -inf }
 0x733   : > { %1471 = vmax.xlane.f32.xlu0 %v1470_v10 }
 0x7bc   : > { %v1472_v18 = vpop.xlane.xlu0 %1471 }
 0x7bd   : > { %v1477_v19 = vrot.slane %v1472_v18, %v3068_v43  ;;  %v1481_v20 = vrot.slane %v1472_v18, %v1480_v12  ;;  %v1485_v22 = vrot.slane %v1472_v18, %v1484_v13  ;;  %v1489_v23 = vrot.slane %v1472_v18, %v1488_v15 }
 0x7be   : > { %v1493_v28 = vrot.slane %v1472_v18, %v1492_v16  ;;  %v1497_v38 = vrot.slane %v1472_v18, %v1496_v27  ;;  %v1505_v32 = vrot.slane %v1472_v18, %v1504_v21 }
 0x7bf   : > { %v1514_v25 = vsub.f32 %v1904_v42, %v1477_v19  ;;  %v1515_v17 = vsub.f32 %v1905_v45, %v1481_v20  ;;  %v1516_v26 = vsub.f32 %v1906_v37, %v1485_v22  ;;  %v1517_v29 = vsub.f32 %v1907_v49, %v1489_v23 }
 0x7c0   : > { %v1518_v39 = vsub.f32 %v1908_v55, %v1493_v28  ;;  %v1501_v37 = vrot.slane %v1472_v18, %v1500_v5  ;;  %v1519_v44 = vsub.f32 %v1909_v61, %v1497_v38  ;;  %v1521_v50 = vsub.f32 %v1911_v4, %v1505_v32 }
 0x7c1   : > { %v1524_v30 = vmul.f32 %v1523_v24, %v1514_v25  ;;  %v1525_v31 = vmul.f32 %v1523_v24, %v1515_v17  ;;  %v1526_v14 = vmul.f32 %v1523_v24, %v1516_v26  ;;  %v1527_v40 = vmul.f32 %v1523_v24, %v1517_v29 }
 0x7c2   : > { %v1528_v45 = vmul.f32 %v1523_v24, %v1518_v39  ;;  %v1520_v47 = vsub.f32 %v1910_v1, %v1501_v37  ;;  %v1529_v48 = vmul.f32 %v1523_v24, %v1519_v44  ;;  %v1531_v55 = vmul.f32 %v1523_v24, %v1521_v50 }
 0x7c3   : > { %v1532_v33 = vmul.f32 1.442695, %v1524_v30  ;;  %v1534_v36 = vmul.f32 1.442695, %v1525_v31  ;;  %v1536_v42 = vmul.f32 1.442695, %v1526_v14 }
 0x7c4   : > { %v1538_v46 = vmul.f32 1.442695, %v1527_v40  ;;  %v1540_v49 = vmul.f32 1.442695, %v1528_v45  ;;  %v1530_v51 = vmul.f32 %v1523_v24, %v1520_v47  ;;  %v1542_v52 = vmul.f32 1.442695, %v1529_v48 }
 0x7c5   : > { %2523 = vpow2.f32 %v1532_v33  ;;  %v1546_v58 = vmul.f32 1.442695, %v1531_v55 }
 0x7c6   : > { %2525 = vpow2.f32 %v1534_v36  ;;  %v1544_v56 = vmul.f32 1.442695, %v1530_v51 }
 0x7c7   : > { %2527 = vpow2.f32 %v1536_v42 }
 0x7c8   : > { %2529 = vpow2.f32 %v1538_v46 }
 0x7c9   : > { %2531 = vpow2.f32 %v1540_v49 }
 0x7ca   : > { %2533 = vpow2.f32 %v1542_v52 }
 0x7cb   : > { %2535 = vpow2.f32 %v1544_v56 }
 0x7cc   : > { %2537 = vpow2.f32 %v1546_v58 }
 0x7d2   : > { %v3134_v53 = vpop.eup %2523 }
 0x7d3   : > { %v3136_v54 = vpop.eup %2525  ;;  %1557 = vperm.xlu1 %2521, %v3134_v53  }
 0x7d4   : > { %1560 = vperm.xlu0 %2522, %v3136_v54   ;;  %v3140_v57 = vpop.eup %2527 }
 0x7d5   : > { %v3143_v59 = vpop.eup %2529 }
 0x7d6   : > { %v3146_v60 = vpop.eup %2531 }
 0x7d7   : > { %1563 = vperm.xlu1 %2521, %v3140_v57   ;;  %v3149_v61 = vpop.eup %2533 }
 0x7d8   : > { %v3152_v34 = vpop.eup %2535 }
 0x7d9   : > { %v3155_v62 = vpop.eup %2537 }
 0x7db   : > { %1566 = vperm.xlu1 %2521, %v3143_v59  }
 0x7df   : > { %1569 = vperm.xlu1 %2521, %v3146_v60  }
 0x7e3   : > { %1572 = vperm.xlu1 %2521, %v3149_v61  }
 0x7e7   : > { %1575 = vperm.xlu1 %2521, %v3152_v34  }
 0x7eb   : > { %1578 = vperm.xlu1 %2521, %v3155_v62  }
 0x84e   : > { %v1558_v63 = vpop.permute.xlu1 %1557 }
 0x84f   : > { %v1561_v3 = vpop.permute.xlu0 %1560  ;;  %v1583_v7 = vrot.slane %v1558_v63, %v3092_v41 }
 0x850   : > { %v1587_v6 = vrot.slane %v1561_v3, %v3092_v41 }
 0x852   : > { %v1564_v0 = vpop.permute.xlu1 %1563  ;;  %v1612_v18 = vsel %vm1454_vm13, %v1587_v6, %v1583_v7 }
 0x853   : > { %v1591_v8 = vrot.slane %v1564_v0, %v3092_v41 }
 0x855   : > { %v1613_v20 = vsel %vm1456_vm14, %v1591_v8, %v1612_v18 }
 0x856   : > { %v1567_v1 = vpop.permute.xlu1 %1566 }
 0x857   : > { %v1595_v9 = vrot.slane %v1567_v1, %v3092_v41 }
 0x859   : > { %v1614_v23 = vsel %vm1458_vm15, %v1595_v9, %v1613_v20 }
 0x85a   : > { %v1570_v2 = vpop.permute.xlu1 %1569 }
 0x85b   : > { %v1599_v10 = vrot.slane %v1570_v2, %v3092_v41 }
 0x85d   : > { %v1615_v24 = vsel %vm1460_vm0, %v1599_v10, %v1614_v23 }
 0x85e   : > { %v1573_v4 = vpop.permute.xlu1 %1572 }
 0x85f   : > { %v1603_v19 = vrot.slane %v1573_v4, %v3092_v41 }
 0x861   : > { %v1616_v17 = vsel %vm1462_vm1, %v1603_v19, %v1615_v24 }
 0x862   : > { %v1576_v11 = vpop.permute.xlu1 %1575 }
 0x863   : > { %v1607_v22 = vrot.slane %v1576_v11, %v3092_v41 }
 0x865   : > { %v1617_v28 = vsel %vm1464_vm2, %v1607_v22, %v1616_v17 }
 0x866   : > { %v1579_v25 = vpop.permute.xlu1 %1578 }
 0x867   : > { %v1611_v26 = vrot.slane %v1579_v25, %v3092_v41 }
 0x869   : > { %v1618_v29 = vsel %vm1466_vm3, %v1611_v26, %v1617_v28 }
 0x86a   : > { %v1620_v30 = vsel %vm1469_vm4, %v1618_v29, 0.0 }
 0x86b   : > { %1621 = vadd.xlane.f32.xlu1 %v1620_v30 }
 0x8f4   : > { %v1622_v31 = vpop.xlane.xlu1 %1621 }
 0x8f5   : > { %v1627_v14 = vrot.slane %v1622_v31, %v3068_v43  ;;  %v1631_v33 = vrot.slane %v1622_v31, %v1480_v12  ;;  %v1635_v36 = vrot.slane %v1622_v31, %v1484_v13  ;;  %v1639_v38 = vrot.slane %v1622_v31, %v1488_v15 }
 0x8f6   : > { %v1643_v39 = vrot.slane %v1622_v31, %v1492_v16  ;;  %v1647_v40 = vrot.slane %v1622_v31, %v1496_v27  ;;  %v1651_v12 = vrot.slane %v1622_v31, %v1500_v5  ;;  %v1655_v16 = vrot.slane %v1622_v31, %v1504_v21 }
 0x8f7   : > { %2539 = vrcp.f32 %v1627_v14 }
 0x8f8   : > { %2541 = vrcp.f32 %v1631_v33 }
 0x8f9   : > { %2543 = vrcp.f32 %v1635_v36 }
 0x8fa   : > { %2545 = vrcp.f32 %v1639_v38 }
 0x8fb   : > { %2547 = vrcp.f32 %v1643_v39 }
 0x8fc   : > { %2549 = vrcp.f32 %v1647_v40 }
 0x8fd   : > { %2551 = vrcp.f32 %v1651_v12 }
 0x8fe   : > { %2553 = vrcp.f32 %v1655_v16 }
 0x904   : > { %v2540_v43 = vpop.eup %2539 }
 0x905   : > { %v2542_v42 = vpop.eup %2541  ;;  %v1665_v13 = vmul.f32 %v2540_v43, %v3134_v53 }
 0x906   : > { %v2544_v37 = vpop.eup %2543  ;;  %v1667_v15 = vmul.f32 %v2542_v42, %v3136_v54 }
 0x907   : > { %v1680_v44 = vmax.f32 %v1665_v13, 1e-06  ;;  %v1669_v27 = vmul.f32 %v2544_v37, %v3140_v57  ;;  %v2546_v32 = vpop.eup %2545 }
 0x908   : > { %v1681_v46 = vmax.f32 %v1667_v15, 1e-06  ;;  %v1671_v48 = vmul.f32 %v2546_v32, %v3143_v59  ;;  %v2548_v49 = vpop.eup %2547 }
 0x909   : > { %v1688_v45 = vmin.f32 %v1680_v44, 0.999999  ;;  %v1682_v5 = vmax.f32 %v1669_v27, 1e-06  ;;  %v1673_v52 = vmul.f32 %v2548_v49, %v3146_v60  ;;  %v2550_v35 = vpop.eup %2549 }
 0x90a   : > { %v1689_v47 = vmin.f32 %v1681_v46, 0.999999  ;;  %v1683_v51 = vmax.f32 %v1671_v48, 1e-06  ;;  %v1675_v54 = vmul.f32 %v2550_v35, %v3149_v61  ;;  %v2552_v55 = vpop.eup %2551 }
 0x90b   : > { %1705 = vperm.xlu0 %2522, %v1688_v45   ;;  %v1690_v50 = vmin.f32 %v1682_v5, 0.999999  ;;  %v1684_v53 = vmax.f32 %v1673_v52, 1e-06  ;;  %v1677_v58 = vmul.f32 %v2552_v55, %v3152_v34  ;;  %v2554_v63 = vpop.eup %2553 }
 0x90c   : > { %v1691_v21 = vmin.f32 %v1683_v51, 0.999999  ;;  %v1685_v57 = vmax.f32 %v1675_v54, 1e-06  ;;  %v1679_v1 = vmul.f32 %v2554_v63, %v3155_v62 }
 0x90d   : > { %v1692_v56 = vmin.f32 %v1684_v53, 0.999999  ;;  %v1686_v0 = vmax.f32 %v1677_v58, 1e-06 }
 0x90e   : > { %v1693_v59 = vmin.f32 %v1685_v57, 0.999999  ;;  %v1687_v2 = vmax.f32 %v1679_v1, 1e-06 }
 0x90f   : > { %1708 = vperm.xlu0 %2522, %v1689_v47   ;;  %v1694_v60 = vmin.f32 %v1686_v0, 0.999999 }
 0x910   : > { %v1695_v3 = vmin.f32 %v1687_v2, 0.999999 }
 0x913   : > { %1711 = vperm.xlu0 %2522, %v1690_v50  }
 0x917   : > { %1714 = vperm.xlu0 %2522, %v1691_v21  }
 0x91b   : > { %1717 = vperm.xlu0 %2522, %v1692_v56  }
 0x91f   : > { %1720 = vperm.xlu0 %2522, %v1693_v59  }
 0x923   : > { %1723 = vperm.xlu0 %2522, %v1694_v60  }
 0x927   : > { %1726 = vperm.xlu0 %2522, %v1695_v3  }
 0x986   : > { %v1706_v61 = vpop.permute.xlu0 %1705 }
 0x987   : > { %v1731_v62 = vrot.slane %v1706_v61, %v3092_v41 }
 0x98a   : > { %v1709_v4 = vpop.permute.xlu0 %1708 }
 0x98b   : > { %v1735_v9 = vrot.slane %v1709_v4, %v3092_v41 }
 0x98d   : > { %v1760_v20 = vsel %vm1454_vm13, %v1735_v9, %v1731_v62 }
 0x98e   : > { %v1712_v6 = vpop.permute.xlu0 %1711 }
 0x98f   : > { %v1739_v10 = vrot.slane %v1712_v6, %v3092_v41 }
 0x991   : > { %v1761_v23 = vsel %vm1456_vm14, %v1739_v10, %v1760_v20 }
 0x992   : > { %v1715_v7 = vpop.permute.xlu0 %1714 }
 0x993   : > { %v1743_v11 = vrot.slane %v1715_v7, %v3092_v41 }
 0x995   : > { %v1762_v25 = vsel %vm1458_vm15, %v1743_v11, %v1761_v23 }
 0x996   : > { %v1718_v8 = vpop.permute.xlu0 %1717 }
 0x997   : > { %v1747_v18 = vrot.slane %v1718_v8, %v3092_v41 }
 0x999   : > { %v1763_v17 = vsel %vm1460_vm0, %v1747_v18, %v1762_v25 }
 0x99a   : > { %v1721_v34 = vpop.permute.xlu0 %1720 }
 0x99b   : > { %v1751_v22 = vrot.slane %v1721_v34, %v3092_v41 }
 0x99d   : > { %v1764_v28 = vsel %vm1462_vm1, %v1751_v22, %v1763_v17 }
 0x99e   : > { %v1724_v19 = vpop.permute.xlu0 %1723 }
 0x99f   : > { %v1755_v24 = vrot.slane %v1724_v19, %v3092_v41 }
 0x9a1   : > { %v1765_v30 = vsel %vm1464_vm2, %v1755_v24, %v1764_v28 }
 0x9a2   : > { %v1727_v26 = vpop.permute.xlu0 %1726 }
 0x9a3   : > { %v1759_v29 = vrot.slane %v1727_v26, %v3092_v41 }
 0x9a5   : > { %v1766_v31 = vsel %vm1466_vm3, %v1759_v29, %v1765_v30 }
 0x9a6   : > { %v1768_v14 = vsel %vm1469_vm4, %v1766_v31, 0.0 }
 0x9a7   : > { %1769 = vst [vmem:[%s215_s30] sm:$0xff] %v1768_v14 }
 0x9a8   : > { %2633 = shalt.err (!%p2630_p7)
}
 0x9a9   : > { %s2634_s4 = scalar_lea.hbm %s3217_s19, 128  ;;  %s2638_s29 = scalar_lea.hbm %s3257_s3, 512 }
 0x9aa   : > { %p2635_p4 = scmp.ne.s32.totalorder %s3217_s19, %s2634_s4  ;;  %p2639_p11 = scmp.lt.s32.totalorder %s3217_s19, %s3257_s3 }
 0x9ab   : > { %p2640_p12 = scmp.lt.s32.totalorder %s2638_s29, %s2634_s4 }
 0x9ac   : > { %p2636_p6 = pnand %p2635_p4, %p3274_p9 }
 0x9ad   : > { %p2641_p13 = por %p2640_p12, %p2639_p11 }
 0x9ae   : > { %p2637_p8 = pneg %p2636_p6 }
 0x9b0   : > { %p2642_p0 = pnand %p2641_p13, %p2637_p8 }
 0x9b2   : > { %2645 = shalt.err (!%p2642_p0)
}
 0x9b3   : > { %2458 = dma.vmem_to_hbm [thread:$0]  (%p3274_p9), %s1785_s5, 128, %s3217_s19, %s1771_s16  }
 0x9b4 PF: > { %p2480_p5 = scmp.ge.s32.totalorder %s2692_s15, 2  ;;  %s1796_s25 = sand.u32 1, %s2680_s12  }
 0x9b5   : > { %p3275_p10 = scmp.ne.s32.totalorder %s3264_s24, 0  ;;  %s1797_s8 = scalar_lea.sflag [#allocation4], %s1796_s25 }
 0x9b7   : > { %p2472_p1 = pnand %p2480_p5, %p3275_p10 }
 0x9b9   : > { %p2473_p2 = pneg %p2472_p1 }
 0x9bb   : > { %2675 = dma.done.wait (%p2473_p2), %s1797_s8, 128  }
 0x9bc   : > { %2677 = vsyncadd (%p2473_p2), %s1797_s8, 4294967168  ;;  %p18_p3 = scmp.ge.s32.totalorder %s2749_s18, 6   ;;  %s3276_s12 = smov %s2684_s13 }
 0x9bd   : > { %s3277_s13 = smov %s2688_s14  ;;  %s3278_s14 = smov %s2761_s21 }
 0x9be   : > { %s3279_s15 = smov %s2749_s18  ;;  %20 = sbr.rel (!%p18_p3) target bundleno = 7 (0x7), region = 86 }
 0x9c3   :  { %1802 = vsyncpa [#allocation3], 1 }
 0x9c4   :  { %1804 = vsyncpa [#allocation3 + $0x1], 1 }
 0x9c5   :  { %1805 = vsyncpa [#allocation8], 1 }
 0x9c6   :  { %1806 = vsyncpa [#allocation4], 1 }
 0x9c7   :  { %1808 = vsyncpa [#allocation4 + $0x1], 1 }
 0x9c8   :  { %1809 = vsyncpa [#allocation5], 1 }
 0x9c9   :  { %1811 = vsyncpa [#allocation5 + $0x1], 1 }

</bundles_post_ra>
